<compile_context>
chip_gen: v6e
topology: v6e:2x2x1
jax: 0.10.0
libtpu: 0.0.40
codegen_flags: <defaults>
</compile_context>

<pallas_src>
import functools
import warnings

import jax
import jax.numpy as jnp
from jax.experimental import pallas as pl
from jax.experimental.pallas import tpu as pltpu


def _round_up(x, m):
    return (x + m - 1) // m * m


def _choose_batch_block(batch, rows_per_elem, target_rows=256, min_grid_steps=2):
    """Largest divisor `bb` of `batch` with bb*rows_per_elem <= target_rows that
    still leaves >= min_grid_steps grid steps (feeds both v7x TensorCores).

    target_rows ~ MXU rows per push: use 256 on v6e/v7x, 128 on v5e.
    """
    cap = max(1, target_rows // max(rows_per_elem, 1))
    best = 1
    for bb in range(1, batch + 1):
        if batch % bb or bb > cap:
            continue
        if batch // bb >= min_grid_steps:
            best = bb
    return best


def _frame_encoder_kernel(x_ref, w_ref, b_ref, o_ref, buf0, buf1, *,
                          K, stride, padding, l_outs, im2col_concat):
    """Fused Conv1d+ReLU stack for `bb` batch elements (one grid step).

    x_ref : (bb, L0_pad, C_pad)        bf16 input, L-halo'd + channel-padded (NLC)
    w_ref : (n_convs, K*C_pad, C_pad)  bf16 im2col-folded weights (all layers)
    b_ref : (n_convs, 1, C_pad)        f32 biases (zero in padded channels)
    o_ref : (bb, L_final, C_pad)       bf16 final activation
    buf0/buf1 : VMEM (bb, L_buf, C_pad) bf16 ping-pong activation scratch (halo'd)
    """
    n_convs = len(l_outs)
    bufs = (buf0, buf1)
    bb = o_ref.shape[0]
    c_pad = o_ref.shape[-1]

    for i in range(n_convs):                     # static unroll over layers
        L_out = l_outs[i]
        src = x_ref if i == 0 else bufs[(i - 1) % 2]

        # im2col: K shifted row-slices, each flattened to (bb*L_out, C_pad).
        taps = []
        for k in range(K):
            if stride == 1:
                sl = pl.ds(k, L_out)
            else:
                # TODO(synk): stride>1 uses sublane-strided reads; re-express as
                # contiguous load + decimation if it ever shows on a profile.
                sl = pl.ds(k, L_out, stride)
            taps.append(src[:, sl, :].reshape(bb * L_out, c_pad))

        if im2col_concat:
            # One MXU matmul with contraction depth K*C_pad
            # (2 pushes on the 256-deep v6e/v7x MXU).
            lhs = jnp.concatenate(taps, axis=-1)
            acc = jnp.dot(lhs, w_ref[i, :, :], preferred_element_type=jnp.float32)
        else:
            # v5e-friendly: K separate depth-C_pad dots (128-deep MXU),
            # avoids the lane-axis concatenate copy.
            acc = jnp.dot(taps[0], w_ref[i, pl.ds(0, c_pad), :],
                          preferred_element_type=jnp.float32)
            for k in range(1, K):
                acc += jnp.dot(taps[k], w_ref[i, pl.ds(k * c_pad, c_pad), :],
                               preferred_element_type=jnp.float32)

        acc = jnp.maximum(acc + b_ref[i, :, :], 0.0)      # bias + ReLU in f32
        # Dropout: identity (inference).  TODO(synk): training-mode dropout.

        out3d = acc.reshape(bb, L_out, c_pad)
        if i + 1 == n_convs:
            o_ref[...] = out3d.astype(o_ref.dtype)
        else:
            dst = bufs[i % 2]
            # Zero the halo rows the FIRST time each ping-pong buffer is
            # written in this grid step.  (A program_id==0-gated one-time init
            # is unsafe here: scratch is per-core and the batch axis is
            # "parallel", i.e. core-sharded on v7x.)  For stride==1 all layers
            # share the same halo rows, so layers i>=2 reuse zeroed halos.
            if padding > 0 and (stride > 1 or i < 2):
                z = jnp.zeros((bb, padding, c_pad), dst.dtype)
                dst[:, pl.ds(0, padding), :] = z
                dst[:, pl.ds(padding + L_out, padding), :] = z
            dst[:, pl.ds(padding, L_out), :] = out3d.astype(dst.dtype)


class FrameEncoder:
    """JAX/Pallas port of the PyTorch FrameEncoder (inference semantics)."""

    def __init__(self, in_channels, num_kernels, kernel_size, stride, num_layers,
                 dropout, padding, *, key, compute_dtype=jnp.bfloat16,
                 im2col_concat=True, target_matmul_rows=256):
        self.in_channels = in_channels
        self.num_kernels = num_kernels
        self.kernel_size = kernel_size
        self.stride = stride
        self.padding = padding
        self.dropout = dropout
        self.compute_dtype = compute_dtype
        self.im2col_concat = im2col_concat          # set False on v5e
        self.target_matmul_rows = target_matmul_rows  # 256 for v6e/v7x, 128 for v5e
        if dropout > 0:
            warnings.warn("FrameEncoder (Pallas): dropout>0 requested but only "
                          "inference semantics (identity dropout) are implemented.")
        # Lane-dense internal channel width (multiple of 128).
        self.c_pad = _round_up(max(in_channels, num_kernels, 1), 128)

        # in block + num_layers hidden blocks + out block = num_layers + 2 convs.
        layer_dims = [(in_channels, num_kernels)]
        layer_dims += [(num_kernels, num_kernels)] * (num_layers + 1)
        self.n_convs = len(layer_dims)

        self.params = []                    # raw (w: (K, C_in, C_out), b: (C_out,))
        w_packed, b_packed = [], []
        for cin, cout in layer_dims:
            key, kw, kb = jax.random.split(key, 3)
            bound = 1.0 / float(cin * kernel_size) ** 0.5   # PyTorch-style uniform
            w = jax.random.uniform(kw, (kernel_size, cin, cout), jnp.float32,
                                   minval=-bound, maxval=bound)
            b = jax.random.uniform(kb, (cout,), jnp.float32,
                                   minval=-bound, maxval=bound)
            self.params.append((w, b))
            wp = jnp.zeros((kernel_size, self.c_pad, self.c_pad), jnp.float32)
            wp = wp.at[:, :cin, :cout].set(w)
            w_packed.append(wp.reshape(kernel_size * self.c_pad, self.c_pad))
            b_packed.append(jnp.zeros((self.c_pad,), jnp.float32).at[:cout].set(b))
        # bf16 weights: halves HBM->VMEM bytes, native-rate MXU, no in-kernel casts.
        self.w_packed = jnp.stack(w_packed).astype(compute_dtype)  # (n, K*Cp, Cp)
        self.b_packed = jnp.stack(b_packed)[:, None, :]            # (n, 1, Cp) f32
        self._single_buffer_ok = None    # None = untried, True/False after 1st call

    def __call__(self, x_ncl):
        """x_ncl: (batch, num_variables, frame_size) -> (batch, num_kernels, L_out)."""
        B, c_in, L0 = x_ncl.shape
        assert c_in == self.in_channels
        K, s, p = self.kernel_size, self.stride, self.padding
        cp, cd = self.c_pad, self.compute_dtype

        # Static per-layer output lengths.
        l_outs, L = [], L0
        for _ in range(self.n_convs):
            L = (L + 2 * p - K) // s + 1
            l_outs.append(L)
        L_final = l_outs[-1]
        L_buf = _round_up(max(l_outs) + 2 * p, 8)

        bb = _choose_batch_block(B, l_outs[0], self.target_matmul_rows)
        n_steps = B // bb

        # One-time layout glue on the (tiny) input: NCL -> NLC, halo rows along
        # L (rounded to a sublane multiple), channels zero-padded to 128 lanes,
        # cast to the bf16 compute dtype.
        L0p = _round_up(L0 + 2 * p, 8)
        x_p = jnp.transpose(x_ncl, (0, 2, 1))
        x_p = jnp.pad(x_p, ((0, 0), (p, L0p - L0 - p), (0, cp - c_in))).astype(cd)

        kernel = functools.partial(
            _frame_encoder_kernel, K=K, stride=s, padding=p,
            l_outs=tuple(l_outs), im2col_concat=self.im2col_concat)

        isz = jnp.dtype(cd).itemsize
        cost = pl.CostEstimate(
            flops=2 * B * sum(l_outs) * K * cp * cp,
            transcendentals=0,
            bytes_accessed=(x_p.size + self.w_packed.size + B * L_final * cp) * isz
                           + self.b_packed.size * 4)

        def build(single_buffer_weights):
            if single_buffer_weights:
                # Grid-invariant operands: no point double-buffering a constant.
                const_spec = lambda shape: pl.BlockSpec(
                    shape, lambda bi: (0, 0, 0), pipeline_mode=pl.Buffered(1))
            else:
                const_spec = lambda shape: pl.BlockSpec(shape, lambda bi: (0, 0, 0))
            return pl.pallas_call(
                kernel,
                out_shape=jax.ShapeDtypeStruct((B, L_final, cp), cd),
                grid_spec=pltpu.PrefetchScalarGridSpec(
                    num_scalar_prefetch=0,
                    grid=(n_steps,),
                    in_specs=[
                        pl.BlockSpec((bb, L0p, cp), lambda bi: (bi, 0, 0)),
                        const_spec((self.n_convs, K * cp, cp)),
                        const_spec((self.n_convs, 1, cp)),
                    ],
                    out_specs=pl.BlockSpec((bb, L_final, cp), lambda bi: (bi, 0, 0)),
                    scratch_shapes=[pltpu.VMEM((bb, L_buf, cp), cd),
                                    pltpu.VMEM((bb, L_buf, cp), cd)],
                ),
                compiler_params=pltpu.CompilerParams(
                    dimension_semantics=("parallel",),
                    # v7x-safe; raise toward 64-96 MiB on v5e/v6e for large
                    # frame_size instead of adding L-tiling.
                    vmem_limit_bytes=32 * 1024 * 1024,
                ),
                cost_estimate=cost,
            )

        want_single = self._single_buffer_ok is not False and hasattr(pl, "Buffered")
        if want_single:
            try:
                out = jax.block_until_ready(
                    build(True)(x_p, self.w_packed, self.b_packed))
                self._single_buffer_ok = True
            except Exception:
                # pipeline_mode=pl.Buffered(1) rejected by this JAX build:
                # fall back to the default double-buffered pipeline.
                self._single_buffer_ok = False
                out = build(False)(x_p, self.w_packed, self.b_packed)
        else:
            out = build(False)(x_p, self.w_packed, self.b_packed)

        # Drop channel padding, back to the module's NCL layout and f32 dtype.
        return jnp.transpose(out[:, :, :self.num_kernels], (0, 2, 1)).astype(jnp.float32)


def _reference_forward(enc: FrameEncoder, x_ncl):
    """Pure-JAX reference (lax.conv) matching the kernel's quantization scheme:
    bf16 operands, f32 accumulation/bias/ReLU, bf16 inter-layer activations."""
    cd = enc.compute_dtype
    x = x_ncl
    for (w, b) in enc.params:
        w_oik = jnp.transpose(w, (2, 1, 0)).astype(cd)          # (C_out, C_in, K)
        x = jax.lax.conv_general_dilated(
            x.astype(cd), w_oik, window_strides=(enc.stride,),
            padding=[(enc.padding, enc.padding)],
            dimension_numbers=("NCH", "OIH", "NCH"),
            preferred_element_type=jnp.float32)
        x = jnp.maximum(x + b[None, :, None], 0.0).astype(cd)
    return x.astype(jnp.float32)


if __name__ == "__main__":
    # Small shapes consistent with the module's forward; batch=4 exercises
    # batch folding (bb=2) while keeping a 2-step "parallel" grid.
    batch, in_channels, frame_size = 4, 4, 16
    num_kernels, kernel_size, stride, num_layers, dropout, padding = 32, 3, 1, 1, 0.0, 1

    key = jax.random.PRNGKey(0)
    key, kx, kp = jax.random.split(key, 3)
    x = jax.random.normal(kx, (batch, in_channels, frame_size), jnp.float32)

    enc = FrameEncoder(in_channels, num_kernels, kernel_size, stride,
                       num_layers, dropout, padding, key=kp)   # bf16 compute

    out = jax.block_until_ready(enc(x))
    ref = jax.block_until_ready(_reference_forward(enc, x))

    L_expected = frame_size
    for _ in range(num_layers + 2):
        L_expected = (L_expected + 2 * padding - kernel_size) // stride + 1
    assert out.shape == (batch, num_kernels, L_expected), out.shape
    # Tolerance accounts for bf16 rounding of intermediate activations
    # (accumulation itself is f32 in both kernel and reference).
    assert jnp.allclose(out, ref, atol=1e-2, rtol=1e-2), \
        float(jnp.max(jnp.abs(out - ref)))

    print("KERNEL_OK")
</pallas_src>

<mosaic_0001>
module attributes {stable_mosaic.version = 11 : i64} {
  func.func @_frame_encoder_kernel(%arg0: i32, %arg1: memref<2x24x128xbf16, #tpu.memory_space<vmem>>, %arg2: memref<3x384x128xbf16, #tpu.memory_space<vmem>>, %arg3: memref<3x1x128xf32, #tpu.memory_space<vmem>>, %arg4: memref<2x16x128xbf16, #tpu.memory_space<vmem>>, %arg5: memref<2x24x128xbf16, #tpu.memory_space<vmem>>, %arg6: memref<2x24x128xbf16, #tpu.memory_space<vmem>>) attributes {dimension_semantics = [#tpu.dimension_semantics<parallel>], iteration_bounds = array<i64: 2>, scalar_prefetch = 0 : i64, scratch_operands = 2 : i64, tpu.core_type = #tpu.core_type<tc>, window_params = [{transform_indices = @transform_0, window_bounds = array<i64: 2, 24, 128>}, {pipeline_mode = #tpu.pipeline_mode<synchronous>, transform_indices = @transform_1, window_bounds = array<i64: 3, 384, 128>}, {pipeline_mode = #tpu.pipeline_mode<synchronous>, transform_indices = @transform_2, window_bounds = array<i64: 3, 1, 128>}, {transform_indices = @transform_3, window_bounds = array<i64: 2, 16, 128>}]} {
    %c0 = arith.constant 0 : index
    %c0_0 = arith.constant 0 : index
    %c0_1 = arith.constant 0 : index
    %0 = vector.load %arg1[%c0, %c0_0, %c0_1] : memref<2x24x128xbf16, #tpu.memory_space<vmem>>, vector<2x16x128xbf16>
    %1 = vector.shape_cast %0 : vector<2x16x128xbf16> to vector<32x128xbf16>
    %c0_2 = arith.constant 0 : index
    %c1 = arith.constant 1 : index
    %c0_3 = arith.constant 0 : index
    %2 = vector.load %arg1[%c0_2, %c1, %c0_3] : memref<2x24x128xbf16, #tpu.memory_space<vmem>>, vector<2x16x128xbf16>
    %3 = vector.shape_cast %2 : vector<2x16x128xbf16> to vector<32x128xbf16>
    %c0_4 = arith.constant 0 : index
    %c2 = arith.constant 2 : index
    %c0_5 = arith.constant 0 : index
    %4 = vector.load %arg1[%c0_4, %c2, %c0_5] : memref<2x24x128xbf16, #tpu.memory_space<vmem>>, vector<2x16x128xbf16>
    %5 = vector.shape_cast %4 : vector<2x16x128xbf16> to vector<32x128xbf16>
    %6 = tpu.concatenate %1, %3, %5 in 1 : vector<32x128xbf16>, vector<32x128xbf16>, vector<32x128xbf16> -> vector<32x384xbf16>
    %c0_6 = arith.constant 0 : index
    %c0_7 = arith.constant 0 : index
    %c0_8 = arith.constant 0 : index
    %7 = vector.load %arg2[%c0_6, %c0_7, %c0_8] : memref<3x384x128xbf16, #tpu.memory_space<vmem>>, vector<1x384x128xbf16>
    %8 = vector.shape_cast %7 : vector<1x384x128xbf16> to vector<384x128xbf16>
    %cst = arith.constant dense<0.000000e+00> : vector<32x128xf32>
    %9 = tpu.matmul %6, %8, %cst {dimension_numbers = #tpu.dot_dimension_numbers<[1], [0], [0], [1], [0, 0, 1, 1], [], []>} : vector<32x384xbf16>, vector<384x128xbf16>, vector<32x128xf32> -> vector<32x128xf32>
    %c0_9 = arith.constant 0 : index
    %c0_10 = arith.constant 0 : index
    %c0_11 = arith.constant 0 : index
    %10 = vector.load %arg3[%c0_9, %c0_10, %c0_11] : memref<3x1x128xf32, #tpu.memory_space<vmem>>, vector<1x1x128xf32>
    %11 = vector.shape_cast %10 : vector<1x1x128xf32> to vector<1x128xf32>
    %12 = vector.broadcast %11 : vector<1x128xf32> to vector<32x128xf32>
    %13 = arith.addf %9, %12 : vector<32x128xf32>
    %cst_12 = arith.constant 0.000000e+00 : f32
    %14 = vector.broadcast %cst_12 : f32 to vector<32x128xf32>
    %15 = arith.maximumf %13, %14 : vector<32x128xf32>
    %16 = vector.shape_cast %15 : vector<32x128xf32> to vector<2x16x128xf32>
    %cst_13 = arith.constant 0.000000e+00 : bf16
    %17 = vector.broadcast %cst_13 : bf16 to vector<2x1x128xbf16>
    %c0_14 = arith.constant 0 : index
    %c0_15 = arith.constant 0 : index
    %c0_16 = arith.constant 0 : index
    %18 = vector.load %arg5[%c0_14, %c0_15, %c0_16] : memref<2x24x128xbf16, #tpu.memory_space<vmem>>, vector<2x1x128xbf16>
    tpu.vector_store %arg5[%c0_14, %c0_15, %c0_16], %17 {strides = array<i32>} : memref<2x24x128xbf16, #tpu.memory_space<vmem>>, vector<2x1x128xbf16>,
    %c0_17 = arith.constant 0 : index
    %c17 = arith.constant 17 : index
    %c0_18 = arith.constant 0 : index
    %19 = vector.load %arg5[%c0_17, %c17, %c0_18] : memref<2x24x128xbf16, #tpu.memory_space<vmem>>, vector<2x1x128xbf16>
    tpu.vector_store %arg5[%c0_17, %c17, %c0_18], %17 {strides = array<i32>} : memref<2x24x128xbf16, #tpu.memory_space<vmem>>, vector<2x1x128xbf16>,
    %20 = arith.truncf %16 : vector<2x16x128xf32> to vector<2x16x128xbf16>
    %c0_19 = arith.constant 0 : index
    %c1_20 = arith.constant 1 : index
    %c0_21 = arith.constant 0 : index
    %21 = vector.load %arg5[%c0_19, %c1_20, %c0_21] : memref<2x24x128xbf16, #tpu.memory_space<vmem>>, vector<2x16x128xbf16>
    tpu.vector_store %arg5[%c0_19, %c1_20, %c0_21], %20 {strides = array<i32>} : memref<2x24x128xbf16, #tpu.memory_space<vmem>>, vector<2x16x128xbf16>,
    %c0_22 = arith.constant 0 : index
    %c0_23 = arith.constant 0 : index
    %c0_24 = arith.constant 0 : index
    %22 = vector.load %arg5[%c0_22, %c0_23, %c0_24] : memref<2x24x128xbf16, #tpu.memory_space<vmem>>, vector<2x16x128xbf16>
    %23 = vector.shape_cast %22 : vector<2x16x128xbf16> to vector<32x128xbf16>
    %c0_25 = arith.constant 0 : index
    %c1_26 = arith.constant 1 : index
    %c0_27 = arith.constant 0 : index
    %24 = vector.load %arg5[%c0_25, %c1_26, %c0_27] : memref<2x24x128xbf16, #tpu.memory_space<vmem>>, vector<2x16x128xbf16>
    %25 = vector.shape_cast %24 : vector<2x16x128xbf16> to vector<32x128xbf16>
    %c0_28 = arith.constant 0 : index
    %c2_29 = arith.constant 2 : index
    %c0_30 = arith.constant 0 : index
    %26 = vector.load %arg5[%c0_28, %c2_29, %c0_30] : memref<2x24x128xbf16, #tpu.memory_space<vmem>>, vector<2x16x128xbf16>
    %27 = vector.shape_cast %26 : vector<2x16x128xbf16> to vector<32x128xbf16>
    %28 = tpu.concatenate %23, %25, %27 in 1 : vector<32x128xbf16>, vector<32x128xbf16>, vector<32x128xbf16> -> vector<32x384xbf16>
    %c1_31 = arith.constant 1 : index
    %c0_32 = arith.constant 0 : index
    %c0_33 = arith.constant 0 : index
    %29 = vector.load %arg2[%c1_31, %c0_32, %c0_33] : memref<3x384x128xbf16, #tpu.memory_space<vmem>>, vector<1x384x128xbf16>
    %30 = vector.shape_cast %29 : vector<1x384x128xbf16> to vector<384x128xbf16>
    %cst_34 = arith.constant dense<0.000000e+00> : vector<32x128xf32>
    %31 = tpu.matmul %28, %30, %cst_34 {dimension_numbers = #tpu.dot_dimension_numbers<[1], [0], [0], [1], [0, 0, 1, 1], [], []>} : vector<32x384xbf16>, vector<384x128xbf16>, vector<32x128xf32> -> vector<32x128xf32>
    %c1_35 = arith.constant 1 : index
    %c0_36 = arith.constant 0 : index
    %c0_37 = arith.constant 0 : index
    %32 = vector.load %arg3[%c1_35, %c0_36, %c0_37] : memref<3x1x128xf32, #tpu.memory_space<vmem>>, vector<1x1x128xf32>
    %33 = vector.shape_cast %32 : vector<1x1x128xf32> to vector<1x128xf32>
    %34 = vector.broadcast %33 : vector<1x128xf32> to vector<32x128xf32>
    %35 = arith.addf %31, %34 : vector<32x128xf32>
    %cst_38 = arith.constant 0.000000e+00 : f32
    %36 = vector.broadcast %cst_38 : f32 to vector<32x128xf32>
    %37 = arith.maximumf %35, %36 : vector<32x128xf32>
    %38 = vector.shape_cast %37 : vector<32x128xf32> to vector<2x16x128xf32>
    %cst_39 = arith.constant 0.000000e+00 : bf16
    %39 = vector.broadcast %cst_39 : bf16 to vector<2x1x128xbf16>
    %c0_40 = arith.constant 0 : index
    %c0_41 = arith.constant 0 : index
    %c0_42 = arith.constant 0 : index
    %40 = vector.load %arg6[%c0_40, %c0_41, %c0_42] : memref<2x24x128xbf16, #tpu.memory_space<vmem>>, vector<2x1x128xbf16>
    tpu.vector_store %arg6[%c0_40, %c0_41, %c0_42], %39 {strides = array<i32>} : memref<2x24x128xbf16, #tpu.memory_space<vmem>>, vector<2x1x128xbf16>,
    %c0_43 = arith.constant 0 : index
    %c17_44 = arith.constant 17 : index
    %c0_45 = arith.constant 0 : index
    %41 = vector.load %arg6[%c0_43, %c17_44, %c0_45] : memref<2x24x128xbf16, #tpu.memory_space<vmem>>, vector<2x1x128xbf16>
    tpu.vector_store %arg6[%c0_43, %c17_44, %c0_45], %39 {strides = array<i32>} : memref<2x24x128xbf16, #tpu.memory_space<vmem>>, vector<2x1x128xbf16>,
    %42 = arith.truncf %38 : vector<2x16x128xf32> to vector<2x16x128xbf16>
    %c0_46 = arith.constant 0 : index
    %c1_47 = arith.constant 1 : index
    %c0_48 = arith.constant 0 : index
    %43 = vector.load %arg6[%c0_46, %c1_47, %c0_48] : memref<2x24x128xbf16, #tpu.memory_space<vmem>>, vector<2x16x128xbf16>
    tpu.vector_store %arg6[%c0_46, %c1_47, %c0_48], %42 {strides = array<i32>} : memref<2x24x128xbf16, #tpu.memory_space<vmem>>, vector<2x16x128xbf16>,
    %c0_49 = arith.constant 0 : index
    %c0_50 = arith.constant 0 : index
    %c0_51 = arith.constant 0 : index
    %44 = vector.load %arg6[%c0_49, %c0_50, %c0_51] : memref<2x24x128xbf16, #tpu.memory_space<vmem>>, vector<2x16x128xbf16>
    %45 = vector.shape_cast %44 : vector<2x16x128xbf16> to vector<32x128xbf16>
    %c0_52 = arith.constant 0 : index
    %c1_53 = arith.constant 1 : index
    %c0_54 = arith.constant 0 : index
    %46 = vector.load %arg6[%c0_52, %c1_53, %c0_54] : memref<2x24x128xbf16, #tpu.memory_space<vmem>>, vector<2x16x128xbf16>
    %47 = vector.shape_cast %46 : vector<2x16x128xbf16> to vector<32x128xbf16>
    %c0_55 = arith.constant 0 : index
    %c2_56 = arith.constant 2 : index
    %c0_57 = arith.constant 0 : index
    %48 = vector.load %arg6[%c0_55, %c2_56, %c0_57] : memref<2x24x128xbf16, #tpu.memory_space<vmem>>, vector<2x16x128xbf16>
    %49 = vector.shape_cast %48 : vector<2x16x128xbf16> to vector<32x128xbf16>
    %50 = tpu.concatenate %45, %47, %49 in 1 : vector<32x128xbf16>, vector<32x128xbf16>, vector<32x128xbf16> -> vector<32x384xbf16>
    %c2_58 = arith.constant 2 : index
    %c0_59 = arith.constant 0 : index
    %c0_60 = arith.constant 0 : index
    %51 = vector.load %arg2[%c2_58, %c0_59, %c0_60] : memref<3x384x128xbf16, #tpu.memory_space<vmem>>, vector<1x384x128xbf16>
    %52 = vector.shape_cast %51 : vector<1x384x128xbf16> to vector<384x128xbf16>
    %cst_61 = arith.constant dense<0.000000e+00> : vector<32x128xf32>
    %53 = tpu.matmul %50, %52, %cst_61 {dimension_numbers = #tpu.dot_dimension_numbers<[1], [0], [0], [1], [0, 0, 1, 1], [], []>} : vector<32x384xbf16>, vector<384x128xbf16>, vector<32x128xf32> -> vector<32x128xf32>
    %c2_62 = arith.constant 2 : index
    %c0_63 = arith.constant 0 : index
    %c0_64 = arith.constant 0 : index
    %54 = vector.load %arg3[%c2_62, %c0_63, %c0_64] : memref<3x1x128xf32, #tpu.memory_space<vmem>>, vector<1x1x128xf32>
    %55 = vector.shape_cast %54 : vector<1x1x128xf32> to vector<1x128xf32>
    %56 = vector.broadcast %55 : vector<1x128xf32> to vector<32x128xf32>
    %57 = arith.addf %53, %56 : vector<32x128xf32>
    %cst_65 = arith.constant 0.000000e+00 : f32
    %58 = vector.broadcast %cst_65 : f32 to vector<32x128xf32>
    %59 = arith.maximumf %57, %58 : vector<32x128xf32>
    %60 = vector.shape_cast %59 : vector<32x128xf32> to vector<2x16x128xf32>
    %61 = arith.truncf %60 : vector<2x16x128xf32> to vector<2x16x128xbf16>
    %c0_66 = arith.constant 0 : index
    %c0_67 = arith.constant 0 : index
    %c0_68 = arith.constant 0 : index
    %62 = vector.load %arg4[%c0_66, %c0_67, %c0_68] : memref<2x16x128xbf16, #tpu.memory_space<vmem>>, vector<2x16x128xbf16>
    tpu.vector_store %arg4[%c0_66, %c0_67, %c0_68], %61 {strides = array<i32>} : memref<2x16x128xbf16, #tpu.memory_space<vmem>>, vector<2x16x128xbf16>,
    return
  }
  func.func @transform_0(%arg0: i32) -> (i32, i32, i32) {
    %c0_i32 = arith.constant 0 : i32
    %c0_i32_0 = arith.constant 0 : i32
    %c0_i32_1 = arith.constant 0 : i32
    return %arg0, %c0_i32, %c0_i32_0 : i32, i32, i32
  }
  func.func @transform_1(%arg0: i32) -> (i32, i32, i32) {
    %c0_i32 = arith.constant 0 : i32
    %c0_i32_0 = arith.constant 0 : i32
    %c0_i32_1 = arith.constant 0 : i32
    %c0_i32_2 = arith.constant 0 : i32
    return %c0_i32, %c0_i32_0, %c0_i32_1 : i32, i32, i32
  }
  func.func @transform_2(%arg0: i32) -> (i32, i32, i32) {
    %c0_i32 = arith.constant 0 : i32
    %c0_i32_0 = arith.constant 0 : i32
    %c0_i32_1 = arith.constant 0 : i32
    %c0_i32_2 = arith.constant 0 : i32
    return %c0_i32, %c0_i32_0, %c0_i32_1 : i32, i32, i32
  }
  func.func @transform_3(%arg0: i32) -> (i32, i32, i32) {
    %c0_i32 = arith.constant 0 : i32
    %c0_i32_0 = arith.constant 0 : i32
    %c0_i32_1 = arith.constant 0 : i32
    return %arg0, %c0_i32, %c0_i32_0 : i32, i32, i32
  }
}

module attributes {stable_mosaic.version = 11 : i64} {
  func.func @_frame_encoder_kernel(%arg0: i32, %arg1: memref<2x24x128xbf16, #tpu.memory_space<vmem>>, %arg2: memref<3x384x128xbf16, #tpu.memory_space<vmem>>, %arg3: memref<3x1x128xf32, #tpu.memory_space<vmem>>, %arg4: memref<2x16x128xbf16, #tpu.memory_space<vmem>>, %arg5: memref<2x24x128xbf16, #tpu.memory_space<vmem>>, %arg6: memref<2x24x128xbf16, #tpu.memory_space<vmem>>) attributes {dimension_semantics = [#tpu.dimension_semantics<parallel>], iteration_bounds = array<i64: 2>, scalar_prefetch = 0 : i64, scratch_operands = 2 : i64, tpu.core_type = #tpu.core_type<tc>, window_params = [{transform_indices = @transform_0, window_bounds = array<i64: 2, 24, 128>}, {pipeline_mode = #tpu.pipeline_mode<synchronous>, transform_indices = @transform_1, window_bounds = array<i64: 3, 384, 128>}, {pipeline_mode = #tpu.pipeline_mode<synchronous>, transform_indices = @transform_2, window_bounds = array<i64: 3, 1, 128>}, {transform_indices = @transform_3, window_bounds = array<i64: 2, 16, 128>}]} {
    %c0 = arith.constant 0 : index
    %c0_0 = arith.constant 0 : index
    %c0_1 = arith.constant 0 : index
    %0 = vector.load %arg1[%c0, %c0_0, %c0_1] : memref<2x24x128xbf16, #tpu.memory_space<vmem>>, vector<2x16x128xbf16>
    %1 = vector.shape_cast %0 : vector<2x16x128xbf16> to vector<32x128xbf16>
    %c0_2 = arith.constant 0 : index
    %c1 = arith.constant 1 : index
    %c0_3 = arith.constant 0 : index
    %2 = vector.load %arg1[%c0_2, %c1, %c0_3] : memref<2x24x128xbf16, #tpu.memory_space<vmem>>, vector<2x16x128xbf16>
    %3 = vector.shape_cast %2 : vector<2x16x128xbf16> to vector<32x128xbf16>
    %c0_4 = arith.constant 0 : index
    %c2 = arith.constant 2 : index
    %c0_5 = arith.constant 0 : index
    %4 = vector.load %arg1[%c0_4, %c2, %c0_5] : memref<2x24x128xbf16, #tpu.memory_space<vmem>>, vector<2x16x128xbf16>
    %5 = vector.shape_cast %4 : vector<2x16x128xbf16> to vector<32x128xbf16>
    %6 = tpu.concatenate %1, %3, %5 in 1 : vector<32x128xbf16>, vector<32x128xbf16>, vector<32x128xbf16> -> vector<32x384xbf16>
    %c0_6 = arith.constant 0 : index
    %c0_7 = arith.constant 0 : index
    %c0_8 = arith.constant 0 : index
    %7 = vector.load %arg2[%c0_6, %c0_7, %c0_8] : memref<3x384x128xbf16, #tpu.memory_space<vmem>>, vector<1x384x128xbf16>
    %8 = vector.shape_cast %7 : vector<1x384x128xbf16> to vector<384x128xbf16>
    %cst = arith.constant dense<0.000000e+00> : vector<32x128xf32>
    %9 = tpu.matmul %6, %8, %cst {dimension_numbers = #tpu.dot_dimension_numbers<[1], [0], [0], [1], [0, 0, 1, 1], [], []>} : vector<32x384xbf16>, vector<384x128xbf16>, vector<32x128xf32> -> vector<32x128xf32>
    %c0_9 = arith.constant 0 : index
    %c0_10 = arith.constant 0 : index
    %c0_11 = arith.constant 0 : index
    %10 = vector.load %arg3[%c0_9, %c0_10, %c0_11] : memref<3x1x128xf32, #tpu.memory_space<vmem>>, vector<1x1x128xf32>
    %11 = vector.shape_cast %10 : vector<1x1x128xf32> to vector<1x128xf32>
    %12 = vector.broadcast %11 : vector<1x128xf32> to vector<32x128xf32>
    %13 = arith.addf %9, %12 : vector<32x128xf32>
    %cst_12 = arith.constant 0.000000e+00 : f32
    %14 = vector.broadcast %cst_12 : f32 to vector<32x128xf32>
    %15 = arith.maximumf %13, %14 : vector<32x128xf32>
    %16 = vector.shape_cast %15 : vector<32x128xf32> to vector<2x16x128xf32>
    %cst_13 = arith.constant 0.000000e+00 : bf16
    %17 = vector.broadcast %cst_13 : bf16 to vector<2x1x128xbf16>
    %c0_14 = arith.constant 0 : index
    %c0_15 = arith.constant 0 : index
    %c0_16 = arith.constant 0 : index
    %18 = vector.load %arg5[%c0_14, %c0_15, %c0_16] : memref<2x24x128xbf16, #tpu.memory_space<vmem>>, vector<2x1x128xbf16>
    tpu.vector_store %arg5[%c0_14, %c0_15, %c0_16], %17 {strides = array<i32>} : memref<2x24x128xbf16, #tpu.memory_space<vmem>>, vector<2x1x128xbf16>,
    %c0_17 = arith.constant 0 : index
    %c17 = arith.constant 17 : index
    %c0_18 = arith.constant 0 : index
    %19 = vector.load %arg5[%c0_17, %c17, %c0_18] : memref<2x24x128xbf16, #tpu.memory_space<vmem>>, vector<2x1x128xbf16>
    tpu.vector_store %arg5[%c0_17, %c17, %c0_18], %17 {strides = array<i32>} : memref<2x24x128xbf16, #tpu.memory_space<vmem>>, vector<2x1x128xbf16>,
    %20 = arith.truncf %16 : vector<2x16x128xf32> to vector<2x16x128xbf16>
    %c0_19 = arith.constant 0 : index
    %c1_20 = arith.constant 1 : index
    %c0_21 = arith.constant 0 : index
    %21 = vector.load %arg5[%c0_19, %c1_20, %c0_21] : memref<2x24x128xbf16, #tpu.memory_space<vmem>>, vector<2x16x128xbf16>
    tpu.vector_store %arg5[%c0_19, %c1_20, %c0_21], %20 {strides = array<i32>} : memref<2x24x128xbf16, #tpu.memory_space<vmem>>, vector<2x16x128xbf16>,
    %c0_22 = arith.constant 0 : index
    %c0_23 = arith.constant 0 : index
    %c0_24 = arith.constant 0 : index
    %22 = vector.load %arg5[%c0_22, %c0_23, %c0_24] : memref<2x24x128xbf16, #tpu.memory_space<vmem>>, vector<2x16x128xbf16>
    %23 = vector.shape_cast %22 : vector<2x16x128xbf16> to vector<32x128xbf16>
    %c0_25 = arith.constant 0 : index
    %c1_26 = arith.constant 1 : index
    %c0_27 = arith.constant 0 : index
    %24 = vector.load %arg5[%c0_25, %c1_26, %c0_27] : memref<2x24x128xbf16, #tpu.memory_space<vmem>>, vector<2x16x128xbf16>
    %25 = vector.shape_cast %24 : vector<2x16x128xbf16> to vector<32x128xbf16>
    %c0_28 = arith.constant 0 : index
    %c2_29 = arith.constant 2 : index
    %c0_30 = arith.constant 0 : index
    %26 = vector.load %arg5[%c0_28, %c2_29, %c0_30] : memref<2x24x128xbf16, #tpu.memory_space<vmem>>, vector<2x16x128xbf16>
    %27 = vector.shape_cast %26 : vector<2x16x128xbf16> to vector<32x128xbf16>
    %28 = tpu.concatenate %23, %25, %27 in 1 : vector<32x128xbf16>, vector<32x128xbf16>, vector<32x128xbf16> -> vector<32x384xbf16>
    %c1_31 = arith.constant 1 : index
    %c0_32 = arith.constant 0 : index
    %c0_33 = arith.constant 0 : index
    %29 = vector.load %arg2[%c1_31, %c0_32, %c0_33] : memref<3x384x128xbf16, #tpu.memory_space<vmem>>, vector<1x384x128xbf16>
    %30 = vector.shape_cast %29 : vector<1x384x128xbf16> to vector<384x128xbf16>
    %cst_34 = arith.constant dense<0.000000e+00> : vector<32x128xf32>
    %31 = tpu.matmul %28, %30, %cst_34 {dimension_numbers = #tpu.dot_dimension_numbers<[1], [0], [0], [1], [0, 0, 1, 1], [], []>} : vector<32x384xbf16>, vector<384x128xbf16>, vector<32x128xf32> -> vector<32x128xf32>
    %c1_35 = arith.constant 1 : index
    %c0_36 = arith.constant 0 : index
    %c0_37 = arith.constant 0 : index
    %32 = vector.load %arg3[%c1_35, %c0_36, %c0_37] : memref<3x1x128xf32, #tpu.memory_space<vmem>>, vector<1x1x128xf32>
    %33 = vector.shape_cast %32 : vector<1x1x128xf32> to vector<1x128xf32>
    %34 = vector.broadcast %33 : vector<1x128xf32> to vector<32x128xf32>
    %35 = arith.addf %31, %34 : vector<32x128xf32>
    %cst_38 = arith.constant 0.000000e+00 : f32
    %36 = vector.broadcast %cst_38 : f32 to vector<32x128xf32>
    %37 = arith.maximumf %35, %36 : vector<32x128xf32>
    %38 = vector.shape_cast %37 : vector<32x128xf32> to vector<2x16x128xf32>
    %cst_39 = arith.constant 0.000000e+00 : bf16
    %39 = vector.broadcast %cst_39 : bf16 to vector<2x1x128xbf16>
    %c0_40 = arith.constant 0 : index
    %c0_41 = arith.constant 0 : index
    %c0_42 = arith.constant 0 : index
    %40 = vector.load %arg6[%c0_40, %c0_41, %c0_42] : memref<2x24x128xbf16, #tpu.memory_space<vmem>>, vector<2x1x128xbf16>
    tpu.vector_store %arg6[%c0_40, %c0_41, %c0_42], %39 {strides = array<i32>} : memref<2x24x128xbf16, #tpu.memory_space<vmem>>, vector<2x1x128xbf16>,
    %c0_43 = arith.constant 0 : index
    %c17_44 = arith.constant 17 : index
    %c0_45 = arith.constant 0 : index
    %41 = vector.load %arg6[%c0_43, %c17_44, %c0_45] : memref<2x24x128xbf16, #tpu.memory_space<vmem>>, vector<2x1x128xbf16>
    tpu.vector_store %arg6[%c0_43, %c17_44, %c0_45], %39 {strides = array<i32>} : memref<2x24x128xbf16, #tpu.memory_space<vmem>>, vector<2x1x128xbf16>,
    %42 = arith.truncf %38 : vector<2x16x128xf32> to vector<2x16x128xbf16>
    %c0_46 = arith.constant 0 : index
    %c1_47 = arith.constant 1 : index
    %c0_48 = arith.constant 0 : index
    %43 = vector.load %arg6[%c0_46, %c1_47, %c0_48] : memref<2x24x128xbf16, #tpu.memory_space<vmem>>, vector<2x16x128xbf16>
    tpu.vector_store %arg6[%c0_46, %c1_47, %c0_48], %42 {strides = array<i32>} : memref<2x24x128xbf16, #tpu.memory_space<vmem>>, vector<2x16x128xbf16>,
    %c0_49 = arith.constant 0 : index
    %c0_50 = arith.constant 0 : index
    %c0_51 = arith.constant 0 : index
    %44 = vector.load %arg6[%c0_49, %c0_50, %c0_51] : memref<2x24x128xbf16, #tpu.memory_space<vmem>>, vector<2x16x128xbf16>
    %45 = vector.shape_cast %44 : vector<2x16x128xbf16> to vector<32x128xbf16>
    %c0_52 = arith.constant 0 : index
    %c1_53 = arith.constant 1 : index
    %c0_54 = arith.constant 0 : index
    %46 = vector.load %arg6[%c0_52, %c1_53, %c0_54] : memref<2x24x128xbf16, #tpu.memory_space<vmem>>, vector<2x16x128xbf16>
    %47 = vector.shape_cast %46 : vector<2x16x128xbf16> to vector<32x128xbf16>
    %c0_55 = arith.constant 0 : index
    %c2_56 = arith.constant 2 : index
    %c0_57 = arith.constant 0 : index
    %48 = vector.load %arg6[%c0_55, %c2_56, %c0_57] : memref<2x24x128xbf16, #tpu.memory_space<vmem>>, vector<2x16x128xbf16>
    %49 = vector.shape_cast %48 : vector<2x16x128xbf16> to vector<32x128xbf16>
    %50 = tpu.concatenate %45, %47, %49 in 1 : vector<32x128xbf16>, vector<32x128xbf16>, vector<32x128xbf16> -> vector<32x384xbf16>
    %c2_58 = arith.constant 2 : index
    %c0_59 = arith.constant 0 : index
    %c0_60 = arith.constant 0 : index
    %51 = vector.load %arg2[%c2_58, %c0_59, %c0_60] : memref<3x384x128xbf16, #tpu.memory_space<vmem>>, vector<1x384x128xbf16>
    %52 = vector.shape_cast %51 : vector<1x384x128xbf16> to vector<384x128xbf16>
    %cst_61 = arith.constant dense<0.000000e+00> : vector<32x128xf32>
    %53 = tpu.matmul %50, %52, %cst_61 {dimension_numbers = #tpu.dot_dimension_numbers<[1], [0], [0], [1], [0, 0, 1, 1], [], []>} : vector<32x384xbf16>, vector<384x128xbf16>, vector<32x128xf32> -> vector<32x128xf32>
    %c2_62 = arith.constant 2 : index
    %c0_63 = arith.constant 0 : index
    %c0_64 = arith.constant 0 : index
    %54 = vector.load %arg3[%c2_62, %c0_63, %c0_64] : memref<3x1x128xf32, #tpu.memory_space<vmem>>, vector<1x1x128xf32>
    %55 = vector.shape_cast %54 : vector<1x1x128xf32> to vector<1x128xf32>
    %56 = vector.broadcast %55 : vector<1x128xf32> to vector<32x128xf32>
    %57 = arith.addf %53, %56 : vector<32x128xf32>
    %cst_65 = arith.constant 0.000000e+00 : f32
    %58 = vector.broadcast %cst_65 : f32 to vector<32x128xf32>
    %59 = arith.maximumf %57, %58 : vector<32x128xf32>
    %60 = vector.shape_cast %59 : vector<32x128xf32> to vector<2x16x128xf32>
    %61 = arith.truncf %60 : vector<2x16x128xf32> to vector<2x16x128xbf16>
    %c0_66 = arith.constant 0 : index
    %c0_67 = arith.constant 0 : index
    %c0_68 = arith.constant 0 : index
    %62 = vector.load %arg4[%c0_66, %c0_67, %c0_68] : memref<2x16x128xbf16, #tpu.memory_space<vmem>>, vector<2x16x128xbf16>
    tpu.vector_store %arg4[%c0_66, %c0_67, %c0_68], %61 {strides = array<i32>} : memref<2x16x128xbf16, #tpu.memory_space<vmem>>, vector<2x16x128xbf16>,
    return
  }
  func.func @transform_0(%arg0: i32) -> (i32, i32, i32) {
    %c0_i32 = arith.constant 0 : i32
    %c0_i32_0 = arith.constant 0 : i32
    %c0_i32_1 = arith.constant 0 : i32
    return %arg0, %c0_i32, %c0_i32_0 : i32, i32, i32
  }
  func.func @transform_1(%arg0: i32) -> (i32, i32, i32) {
    %c0_i32 = arith.constant 0 : i32
    %c0_i32_0 = arith.constant 0 : i32
    %c0_i32_1 = arith.constant 0 : i32
    %c0_i32_2 = arith.constant 0 : i32
    return %c0_i32, %c0_i32_0, %c0_i32_1 : i32, i32, i32
  }
  func.func @transform_2(%arg0: i32) -> (i32, i32, i32) {
    %c0_i32 = arith.constant 0 : i32
    %c0_i32_0 = arith.constant 0 : i32
    %c0_i32_1 = arith.constant 0 : i32
    %c0_i32_2 = arith.constant 0 : i32
    return %c0_i32, %c0_i32_0, %c0_i32_1 : i32, i32, i32
  }
  func.func @transform_3(%arg0: i32) -> (i32, i32, i32) {
    %c0_i32 = arith.constant 0 : i32
    %c0_i32_0 = arith.constant 0 : i32
    %c0_i32_1 = arith.constant 0 : i32
    return %arg0, %c0_i32, %c0_i32_0 : i32, i32, i32
  }
}

</mosaic_0001>

<bundles_post_ra>
// kernel: tpu_custom_call.1
= control target key start
LH: loop header
LB: loop body
LE: loop exit
PB: predicated region body
PF: predicated region fallthrough
CT: control target
= control target key end

     0   :  { %8 = vsyncpa [#allocation5], 0  ;;  %s2674_s0 = inlined_call_operand.hbm [shape: bf16[4,24,128], index: 0, kind: input, shape index: {}]   ;;  %s2675_s1 = inlined_call_operand.hbm [shape: bf16[3,384,128], index: 1, kind: input, shape index: {}]   ;;  %s2676_s2 = inlined_call_operand.vmem [shape: f32[3,1,128], index: 2, kind: input, shape index: {}]   ;;  %s2677_s3 = inlined_call_operand.hbm [shape: bf16[4,16,128], index: 3, kind: output, shape index: {}]  }
   0x1   :  { %10 = vsyncpa [#allocation5 + $0x1], 0 }
   0x2   :  { %11 = vsyncpa [#allocation8], 0 }
   0x3   :  { %12 = vsyncpa [#allocation6], 0 }
   0x4   :  { %14 = vsyncpa [#allocation6 + $0x1], 0  ;;  %s2349_s12 = smov 0   ;;  %s2351_s13 = smov 0  }
   0x5   :  { %s2353_s14 = smov 0   ;;  %s2355_s15 = smov 0  }
   0x6 LB: > { %s2370_s16 = sadd.s32 4294967295, %s2320_s15   ;;  %s1728_s17 = sadd.s32 4294967294, %s2320_s15   ;;  %s2320_s15 = sphi %s2355_s15, %s2711_s15   ;;  %s2316_s14 = sphi %s2353_s14, %s2710_s14   ;;  %s2312_s13 = sphi %s2351_s13, %s2709_s13   ;;  %s2308_s12 = sphi %s2349_s12, %s2708_s12  }
   0x7   : > { %p40_p0 = scmp.ne.s32.totalorder %s2312_s13, %s2308_s12  ;;  %p2678_p1 = scmp.eq.s32.totalorder %s2370_s16, 0 }
   0x8   : > { %p112_p3 = scmp.eq.s32.totalorder %s1728_s17, 1  ;;  %p1729_p5 = scmp.ge.s32.totalorder %s2320_s15, 1 }
   0x9   : > { %p2379_p4 = por %p2678_p1, %p40_p0  ;;  %p119_p7 = scmp.lt.s32.totalorder %s2320_s15, 3 }
   0xa   : > { %p2384_p6 = por %p112_p3, %p40_p0  ;;  %s2322_s21 = smov [#allocation7]  }
   0xb   : > { %s2682_s18 = scalar_select %p2379_p4, 1, 0 }
   0xc   : > { %s2683_s19 = scalar_select %p2384_p6, 1, 0 }
   0xd   : > { %p2389_p8 = pnand %p1729_p5, %p119_p7  ;;  %s131_s22 = sshll.u32 %s2322_s21, 4  ;;  %s132_s22 = int_to_ptr.vmem [resolvable:$true] %s131_s22 }
   0xe   : > { %s2403_s24 = sadd.s32 1, %s2320_s15   ;;  %s27_s25 = sadd.s32 1, %s2316_s14 }
   0xf   : > { %s2684_s20 = scalar_select %p2389_p8, 1, 0 }
  0x10   : > { %p2067_p9 = pneg %p2389_p8  ;;  %s24_s26 = ssub.s32 %s2320_s15, %s2403_s24 }
  0x11   : > { %s2209_s27 = scalar_lea.vmem %s132_s22, 9216  ;;  %p2217_p5 = scmp.lt.s32.totalorder %s132_s22, %s132_s22 }
  0x12   : > { %p2398_p11 = pnand %p2067_p9, %p2678_p1  ;;  %p2210_p13 = scmp.ne.s32.totalorder %s132_s22, %s2209_s27 }
  0x13   : > { %p2218_p7 = scmp.lt.s32.totalorder %s2209_s27, %s2209_s27 }
  0x14   : > { %p2200_p12 = pneg %p2398_p11 }
  0x15   : > { %p2219_p10 = por %p2218_p7, %p2217_p5 }
  0x16   : > { %p2212_p0 = pnand %p2210_p13, %p2200_p12 }
  0x18   : > { %p2213_p3 = pneg %p2212_p0 }
  0x1a   : > { %p2220_p2 = pnand %p2219_p10, %p2213_p3 }
  0x1c   : > { %2223 = shalt.err (!%p2220_p2)
}
  0x1d   : > { %s2323_s28 = smov 64   ;;  %s2324_s29 = smov 4  }
  0x1e   : > { %2070 = dma.hbm_to_vmem [thread:$0]  (!%p2398_p11), %s2675_s1, 9216, %s132_s22, [#allocation8], %s2323_s28, %s2323_s28, %s2324_s29  }
  0x1f   : > { %p25_p2 = scmp.eq.s32.totalorder %s24_s26, 0  ;;  %p34_p9 = scmp.ne.s32.totalorder %s2316_s14, %s2312_s13 }
  0x20   : > { %p35_p10 = scmp.eq.s32.totalorder %s2320_s15, 0  ;;  %p2080_p12 = scmp.lt.s32.totalorder %s2320_s15, 2 }
  0x21   : > { %s2423_s5 = scalar_select %p25_p2, %s2316_s14, %s27_s25  }
  0x22   : > { %p36_p13 = por %p35_p10, %p34_p9  ;;  %p2686_p0 = scmp.eq.s32.totalorder %s2370_s16, 1 }
  0x23   : > { %s148_s7 = sand.u32 1, %s2316_s14   ;;  %s2057_s8 = smul.u32 384, %s2320_s15 }
  0x24   : > { %p2427_p3 = por %p2686_p0, %p34_p9  ;;  %s2056_s9 = smul.u32 24, %s148_s7 }
  0x25   : > { %p2433_p5 = pnand %p2080_p12, %p36_p13  ;;  %s2440_s21 = scalar_lea.hbm %s2674_s0, %s2057_s8 }
  0x26   : > { %s2687_s6 = scalar_select %p2427_p3, 1, 0 }
  0x27   : > { %s152_s22 = scalar_lea.vmem [#allocation4], %s2056_s9  ;;  %s2444_s25 = scalar_lea.sflag [#allocation5], %s148_s7 }
  0x28   : > { %s160_s23 = sshll.u32 %s152_s22, 4  ;;  %s2224_s26 = scalar_lea.hbm %s2440_s21, 384  ;;  %s2442_s23 = int_to_ptr.vmem [resolvable:$true] %s160_s23 }
  0x29   : > { %p2225_p11 = scmp.ne.s32.totalorder %s2440_s21, %s2224_s26  ;;  %p2226_p7 = pneg %p2433_p5 }
  0x2a   : > { %s2229_s4 = scalar_lea.hbm %s2674_s0, 768  ;;  %p2230_p10 = scmp.lt.s32.totalorder %s2440_s21, %s2674_s0 }
  0x2b   : > { %p2227_p2 = pnand %p2226_p7, %p2225_p11  ;;  %p2231_p12 = scmp.lt.s32.totalorder %s2229_s4, %s2224_s26 }
  0x2d   : > { %p2228_p9 = pneg %p2227_p2  ;;  %p2232_p13 = por %p2231_p12, %p2230_p10 }
  0x2f   : > { %p2233_p0 = pnand %p2232_p13, %p2228_p9 }
  0x31   : > { %2236 = shalt.err (!%p2233_p0)
}
  0x32   : > { %s2237_s7 = scalar_lea.vmem %s2442_s23, 384  ;;  %s2325_s9 = smov [#allocation4]  }
  0x33   : > { %p2238_p1 = scmp.ne.s32.totalorder %s2442_s23, %s2237_s7  ;;  %s2242_s17 = sshll.u32 %s2325_s9, 4  ;;  %s2243_s17 = int_to_ptr.vmem [resolvable:$false] %s2242_s17 }
  0x34   : > { %s2244_s22 = scalar_lea.vmem %s2243_s17, 768  ;;  %p2245_p2 = scmp.lt.s32.totalorder %s2442_s23, %s2243_s17 }
  0x35   : > { %p2240_p6 = pnand %p2238_p1, %p2226_p7  ;;  %p2246_p3 = scmp.lt.s32.totalorder %s2244_s22, %s2237_s7 }
  0x37   : > { %p2241_p11 = pneg %p2240_p6  ;;  %p2247_p4 = por %p2246_p3, %p2245_p2 }
  0x39   : > { %p2248_p8 = pnand %p2247_p4, %p2241_p11 }
  0x3b   : > { %2251 = shalt.err (!%p2248_p8)
}
  0x3c   : > { %2074 = dma.hbm_to_vmem [thread:$0]  (!%p2433_p5), %s2440_s21, 384, %s2442_s23, %s2444_s25, %s2323_s28, %s2323_s28, %s2324_s29  }
  0x3d   : > { %p2689_p1 = scmp.ne.s32.totalorder %s2684_s20, 0 }
  0x3e   : > { %s2471_s26 = sand.u32 (!%p2689_p1), 1, %s2312_s13   ;;  %p2690_p4 = scmp.ne.s32.totalorder (!%p2689_p1), %s2682_s18, 0 }
  0x3f   : > { %172 = sbr.rel (%p2689_p1) target bundleno = 811 (0x32b), region = 32  ;;  %s175_s30 = scalar_lea.sflag (!%p2689_p1), [#allocation5], %s2471_s26 }
  0x40   : > { %s2058_s27 = smul.u32 (!%p2689_p1), 24, %s2471_s26 }
  0x42   : > { %s2475_s4 = scalar_lea.vmem (!%p2689_p1), [#allocation4], %s2058_s27 }
  0x44   : > { %2295 = dma.done.wait (%p2690_p4), %s175_s30, 384  }
  0x45   : > { %2297 = vsyncadd (%p2690_p4), %s175_s30, 4294966912  ;;  %p2691_p6 = scmp.eq.s32.totalorder %s2370_s16, 0 }
  0x47   : > { %2299 = dma.done.wait (%p2691_p6), [#allocation8], 9216   ;;  %p2692_p8 = pmov %p2691_p6 }
  0x48   : > { %v2120_v0 = vld [vmem:[#allocation7 + $0x78] sm:$0xff]   ;;  %v2123_v3 = vld [vmem:[#allocation7 + $0x70] sm:$0xff]   ;;  %v2126_v6 = vld [vmem:[#allocation7 + $0x68] sm:$0xff]   ;;  %vm218_vm0 = vsmask.f32 3328  ;;  %vm277_vm2 = vcmask 1042432  }
  0x49   : > { %2301 = vsyncadd (%p2692_p8), [#allocation8], 4294958080  ;;  %v2121_v1 = vld [vmem:[#allocation7 + $0xb8] sm:$0xff]   ;;  %1882 = vmatprep.subr.bf16.mxu0 %v2120_v0  ;;  %v2124_v4 = vld [vmem:[#allocation7 + $0xb0] sm:$0xff]   ;;  %vm219_vm1 = vsmask.f32 7440 }
  0x4a   : > { %v2122_v2 = vld [vmem:[#allocation7 + $0x38] sm:$0xff]   ;;  %1996 = vmatprep.subr.bf16.mxu1 %v2121_v1  ;;  %v2125_v5 = vld [vmem:[#allocation7 + $0x30] sm:$0xff]   ;;  %v2127_v7 = vld [vmem:[#allocation7 + $0xa8] sm:$0xff]   ;;  %vm278_vm3 = vcmask 1046532   ;;  %vm623_vm6 = vcmask 1040384   ;;  %vm694_vm11 = vcmask 1043456  }
  0x4b   : > { %1883 = vmatpush3.bf16.msra.mxu0 %v2122_v2  ;;  %1997 = vmatpush3.bf16.msra.mxu1 %v2121_v1  ;;  %v2128_v8 = vld [vmem:[#allocation7 + $0x28] sm:$0xff]   ;;  %v2129_v9 = vld [vmem:[#allocation7 + $0x60] sm:$0xff]   ;;  %v2132_v12 = vld [vmem:[#allocation7 + $0x58] sm:$0xff]   ;;  %vm624_vm7 = vsmask.f32 256  ;;  %s1737_s23 = sshll.u32 %s2471_s26, 4 }
  0x4c   : > { %1884 = vmatprep.subr.bf16.mxu0 %v2123_v3  ;;  %1998 = vmatprep.subr.bf16.mxu1 %v2124_v4  ;;  %v2130_v10 = vld [vmem:[#allocation7 + $0xa0] sm:$0xff]   ;;  %v2133_v13 = vld [vmem:[#allocation7 + $0x98] sm:$0xff]   ;;  %v2135_v15 = vld [vmem:[#allocation7 + $0x50] sm:$0xff]   ;;  %vm632_vm9 = vsmask.f32 7938  ;;  %s204_s25 = scalar_lea.vmem [#allocation9], %s1737_s23 }
  0x4d   : > { %v2131_v11 = vld [vmem:[#allocation7 + $0x20] sm:$0xff]   ;;  %v2134_v14 = vld [vmem:[#allocation7 + $0x18] sm:$0xff]   ;;  %v2136_v16 = vld [vmem:[#allocation7 + $0x90] sm:$0xff]   ;;  %vm652_vm13 = vsmask.f32 4368  ;;  %s1645_s8 = sshll.u32 %s204_s25, 4  ;;  %s2626_s8 = int_to_ptr.vmem [resolvable:$true] %s1645_s8 }
  0x4e   : > { %v2137_v17 = vld [vmem:[#allocation7 + $0x10] sm:$0xff]   ;;  %v2138_v18 = vld [vmem:[#allocation7 + $0x48] sm:$0xff]   ;;  %v2141_v21 = vld [vmem:[#allocation7 + $0x40] sm:$0xff]   ;;  %s1870_s11 = sshll.u32 %s2370_s16, 8  ;;  %s1631_s22 = scalar_lea.sflag [#allocation6], %s2471_s26 }
  0x4f   : > { %1885 = vmatpush3.bf16.msra.mxu0 %v2125_v5  ;;  %1999 = vmatpush3.bf16.msra.mxu1 %v2124_v4  ;;  %v2139_v19 = vld [vmem:[#allocation7 + $0x88] sm:$0xff]   ;;  %v2142_v22 = vld [vmem:[#allocation7 + $0x80] sm:$0xff]   ;;  %v214_v25 = vld [vmem:[%s2475_s4 + $0x8] sm:$0x1]  ;;  %s2631_s17 = scalar_lea.hbm %s2677_s3, %s1870_s11  ;;  %s2252_s27 = scalar_lea.vmem %s2626_s8, 256 }
  0x50   : > { %1886 = vmatprep.subr.bf16.mxu0 %v2126_v6  ;;  %2000 = vmatprep.subr.bf16.mxu1 %v2127_v7  ;;  %v2140_v20 = vld [vmem:[#allocation7 + $0x8] sm:$0xff]   ;;  %vm2491_vm4 = vmor %vm277_vm2, %vm278_vm3  ;;  %v241_v32 = vshll.u32 %v214_v25, 16  ;;  %v285_v35 = vrot.slane %v214_v25, 5  ;;  %v2143_v40 = vld [vmem:[#allocation7] sm:$0xff]   ;;  %p2253_p3 = scmp.ne.s32.totalorder %s2626_s8, %s2252_s27  ;;  %p2705_p5 = scmp.ne.s32.totalorder %s2687_s6, 0 }
  0x51   : > { %v212_v23 = vld [vmem:[%s2475_s4] sm:$0xf]  ;;  %v213_v24 = vld [vmem:[%s2475_s4 + $0x4] sm:$0xf]  ;;  %v216_v44 = vld [vmem:[%s2475_s4 + $0x10] sm:$0xf] }
  0x52   : > { %v222_v26 = vshrl.u32 %v212_v23, 16  ;;  %v225_v27 = vshll.u32 %v212_v23, 16  ;;  %v231_v28 = vshll.u32 %v213_v24, 16  ;;  %v235_v29 = vshrl.u32 %v213_v24, 16  ;;  %v269_v30 = vld [vmem:[%s2475_s4] sm:$0xe]  ;;  %vm2502_vm5 = vmor %vm218_vm0, %vm219_vm1  ;;  %p2254_p7 = pnand %p2253_p3, %p2705_p5 }
  0x53   : > { %1887 = vmatpush3.bf16.msra.mxu0 %v2128_v8  ;;  %2001 = vmatpush3.bf16.msra.mxu1 %v2127_v7  ;;  %v1738_v33 = vrot.slane %v269_v30, 9  ;;  %v282_v34 = vrot.slane %v213_v24, 5  ;;  %v243_v41 = vrot.slane %v241_v32, 5  ;;  %v217_v47 = vld [vmem:[%s2475_s4 + $0x14] sm:$0x1]  ;;  %v289_v49 = vrot.slane %v216_v44, 5  ;;  %vm2524_vm8 = vmand %vm623_vm6, %vm624_vm7 }
  0x54   : > { %1888 = vmatprep.subr.bf16.mxu0 %v2129_v9  ;;  %2002 = vmatprep.subr.bf16.mxu1 %v2130_v10  ;;  %v224_v36 = vrot.slane %v222_v26, 4  ;;  %v227_v37 = vrot.slane %v225_v27, 5  ;;  %v233_v38 = vrot.slane %v231_v28, 5  ;;  %v237_v39 = vrot.slane %v235_v29, 4  ;;  %v270_v48 = vld [vmem:[%s2475_s4 + $0xc] sm:$0xe]  ;;  %vm2531_vm10 = vmand %vm623_vm6, %vm632_vm9  ;;  %p2255_p9 = pneg %p2254_p7 }
  0x55   : > { %v283_v42 = vsel %vm2491_vm4, %v1738_v33, %v282_v34  ;;  %v284_v43 = vrot.slane %v282_v34, 4  ;;  %v255_v50 = vshll.u32 %v216_v44, 16  ;;  %v1739_v53 = vrot.slane %v270_v48, 9  ;;  %v215_v55 = vld [vmem:[%s2475_s4 + $0xc] sm:$0xf]  ;;  %v2144_v3 = vld [vmem:[%s2475_s4] sm:$0xff]   ;;  %vm2549_vm12 = vmand %vm694_vm11, %vm632_vm9 }
  0x56   : > { %v228_v45 = vor.u32 %v227_v37, %v224_v36  ;;  %v238_v46 = vor.u32 %v237_v39, %v233_v38  ;;  %v292_v54 = vrot.slane %v217_v47, 5  ;;  %v259_v56 = vshrl.u32 %v216_v44, 16  ;;  %v637_v25 = vld [vmem:[#allocation2 + $0x14] sm:$0x1]  ;;  %v2146_v28 = vld [vmem:[#allocation7 + $0x138] sm:$0xff]   ;;  %v2152_v37 = vld [vmem:[#allocation7 + $0x128] sm:$0xff]  }
  0x57   : > { %1889 = vmatpush3.bf16.msra.mxu0 %v2131_v11  ;;  %2003 = vmatpush3.bf16.msra.mxu1 %v2130_v10  ;;  %v286_v52 = vsel %vm2491_vm4, %v284_v43, %v285_v35  ;;  %v291_v60 = vrot.slane %v289_v49, 4  ;;  %v290_v61 = vsel %vm2491_vm4, %v1739_v53, %v289_v49  ;;  %v246_v62 = vshrl.u32 %v215_v55, 16  ;;  %v2147_v29 = vld [vmem:[#allocation7 + $0xf8] sm:$0xff]   ;;  %v2149_v32 = vld [vmem:[#allocation7 + $0x130] sm:$0xff]   ;;  %v629_v34 = vld [vmem:[#allocation2 + $0xc] sm:$0x1] }
  0x58   : > { %1890 = vmatprep.subr.bf16.mxu0 %v2132_v12  ;;  %2004 = vmatprep.subr.bf16.mxu1 %v2133_v13  ;;  %v229_v57 = vrot.slane %v228_v45, 4  ;;  %v239_v58 = vrot.slane %v238_v46, 4  ;;  %v1744_v59 = vcombine.low %v283_v42, %v286_v52  ;;  %v249_v63 = vshll.u32 %v215_v55, 16  ;;  %v2148_v30 = vld [vmem:[#allocation7 + $0x178] sm:$0xff]   ;;  %v2150_v33 = vld [vmem:[#allocation7 + $0xf0] sm:$0xff]   ;;  %v2153_v42 = vld [vmem:[#allocation7 + $0xe8] sm:$0xff]  }
  0x59   : > { %v257_v0 = vrot.slane %v255_v50, 5  ;;  %v293_v4 = vsel %vm2491_vm4, %v291_v60, %v292_v54  ;;  %v261_v5 = vrot.slane %v259_v56, 4  ;;  %v248_v8 = vrot.slane %v246_v62, 4  ;;  %v2151_v36 = vld [vmem:[#allocation7 + $0x170] sm:$0xff]   ;;  %v1130_v39 = vld [vmem:[#allocation3 + $0x14] sm:$0x1]  ;;  %vm2556_vm14 = vmor %vm624_vm7, %vm652_vm13 }
  0x5a   : > { %v234_v1 = vsel %vm2502_vm5, %v229_v57, %v233_v38  ;;  %v244_v2 = vsel %vm2502_vm5, %v239_v58, %v243_v41  ;;  %2012 = vmatprep.mubr.bf16.mxu1 %v1744_v59  ;;  %v1745_v7 = vcombine.low %v290_v61, %v293_v4  ;;  %v251_v9 = vrot.slane %v249_v63, 5  ;;  %v1127_v38 = vld [vmem:[#allocation3 + $0x8] sm:$0x1]  ;;  %v2154_v43 = vld [vmem:[#allocation7 + $0x168] sm:$0xff]   ;;  %v2159_v48 = vld [vmem:[#allocation7 + $0xd8] sm:$0xff]   ;;  %s2326_s16 = smov [#allocation9]  }
  0x5b   : > { %1891 = vmatpush3.bf16.msra.mxu0 %v2134_v14  ;;  %2005 = vmatpush3.bf16.msra.mxu1 %v2133_v13  ;;  %v1742_v6 = vcombine.low %v234_v1, %v244_v2  ;;  %v262_v10 = vor.u32 %v261_v5, %v257_v0  ;;  %v265_v11 = vshll.u32 %v217_v47, 16  ;;  %v638_v27 = vsel %vm2531_vm10, 0, %v637_v25  ;;  %v2155_v44 = vld [vmem:[#allocation7 + $0x120] sm:$0xff]   ;;  %v2158_v47 = vld [vmem:[#allocation7 + $0x118] sm:$0xff]   ;;  %v2161_v50 = vld [vmem:[#allocation7 + $0x110] sm:$0xff]   ;;  %s2256_s30 = sshll.u32 %s2326_s16, 4  ;;  %s2257_s30 = int_to_ptr.vmem [resolvable:$false] %s2256_s30 }
  0x5c   : > { %1892 = vmatprep.subr.bf16.mxu0 %v2135_v15  ;;  %2006 = vmatprep.subr.bf16.mxu1 %v2136_v16  ;;  %v252_v12 = vor.u32 %v251_v9, %v248_v8  ;;  %639 = vst [vmem:[#allocation2 + $0x14] sm:$0x1] %v638_v27  ;;  %v630_v35 = vsel %vm2524_vm8, 0, %v629_v34  ;;  %v1131_v41 = vsel %vm2531_vm10, 0, %v1130_v39  ;;  %v2156_v45 = vld [vmem:[#allocation7 + $0xe0] sm:$0xff]   ;;  %v2160_v49 = vld [vmem:[#allocation7 + $0x158] sm:$0xff]   ;;  %p2259_p10 = scmp.lt.s32.totalorder %s2626_s8, %s2257_s30 }
  0x5d   : > { %553 = vmatprep.mubr.bf16.mxu0 %v1742_v6  ;;  %v263_v13 = vrot.slane %v262_v10, 4  ;;  %v267_v14 = vrot.slane %v265_v11, 5  ;;  %631 = vst [vmem:[#allocation2 + $0xc] sm:$0x1] %v630_v35  ;;  %1132 = vst [vmem:[#allocation3 + $0x14] sm:$0x1] %v1131_v41 }
  0x5e   : > { %v253_v15 = vrot.slane %v252_v12, 4  ;;  %v2157_v46 = vld [vmem:[#allocation7 + $0x160] sm:$0xff]   ;;  %v2162_v52 = vld [vmem:[#allocation7 + $0xd0] sm:$0xff]   ;;  %v2164_v54 = vld [vmem:[#allocation7 + $0x108] sm:$0xff]  }
  0x5f   : > { %1893 = vmatpush3.bf16.msra.mxu0 %v2137_v17  ;;  %2007 = vmatpush3.bf16.msra.mxu1 %v2136_v16  ;;  %v268_v16 = vsel %vm2502_vm5, %v263_v13, %v267_v14  ;;  %v2145_v17 = vld [vmem:[%s2475_s4 + $0xc] sm:$0xff]   ;;  %v2165_v55 = vld [vmem:[#allocation7 + $0xc8] sm:$0xff]   ;;  %s2258_s4 = scalar_lea.vmem %s2257_s30, 512 }
  0x60   : > { %1894 = vmatprep.subr.bf16.mxu0 %v2138_v18  ;;  %2008 = vmatprep.subr.bf16.mxu1 %v2139_v19  ;;  %v258_v18 = vsel %vm2502_vm5, %v253_v15, %v257_v0  ;;  %v2163_v53 = vld [vmem:[#allocation7 + $0x150] sm:$0xff]   ;;  %v2166_v56 = vld [vmem:[#allocation7 + $0x148] sm:$0xff]   ;;  %v2167_v57 = vld [vmem:[#allocation7 + $0x100] sm:$0xff]   ;;  %p2260_p12 = scmp.lt.s32.totalorder %s2258_s4, %s2252_s27 }
  0x61   : > { %v2168_v58 = vld [vmem:[#allocation7 + $0xc0] sm:$0xff]  }
  0x62   : > { %v2169_v59 = vld [vmem:[#allocation7 + $0x140] sm:$0xff]   ;;  %p2261_p13 = por %p2260_p12, %p2259_p10 }
  0x63   : > { %1895 = vmatpush3.bf16.msra.mxu0 %v2140_v20  ;;  %2009 = vmatpush3.bf16.msra.mxu1 %v2139_v19  ;;  %v1743_v19 = vcombine.low %v258_v18, %v268_v16  ;;  %v1746_v63 = vld [vmem:[%s2676_s2] ss:$0 sm:$0xff] }
  0x64   : > { %1896 = vmatprep.subr.bf16.mxu0 %v2141_v21  ;;  %2010 = vmatprep.subr.bf16.mxu1 %v2142_v22  ;;  %v626_v21 = vld [vmem:[#allocation2] sm:$0x1]  ;;  %p2262_p0 = pnand %p2261_p13, %p2255_p9 }
  0x65   : > { %v627_v23 = vsel %vm2524_vm8, 0, %v626_v21 }
  0x66   : > { %628 = vst [vmem:[#allocation2] sm:$0x1] %v627_v23 }
  0x67   : > { %1897 = vmatpush3.bf16.msra.mxu0 %v2143_v40  ;;  %2011 = vmatpush3.bf16.msra.mxu1 %v2142_v22  ;;  %v634_v22 = vld [vmem:[#allocation2 + $0x8] sm:$0x1]  ;;  %v1128_v40 = vsel %vm2531_vm10, 0, %v1127_v38 }
  0x68   : > { %v635_v26 = vsel %vm2531_vm10, 0, %v634_v22  ;;  %1920 = vmatprep.subr.bf16.mxu0 %v2146_v28  ;;  %2016 = vmatprep.subr.bf16.mxu1 %v2148_v30  ;;  %1129 = vst [vmem:[#allocation3 + $0x8] sm:$0x1] %v1128_v40 }
  0x69   : > { %636 = vst [vmem:[#allocation2 + $0x8] sm:$0x1] %v635_v26 }
  0x6a   : > { %2013 = vmatmul.mubr.bf16.vlgmr.msra.gmra.mxu1 %v1745_v7  ;;  %554 = vmatmul.mubr.bf16.vlgmr.msra.gmra.mxu0 %v2144_v3 }
  0x6b   : > { %561 = vmatprep.mubr.bf16.mxu0 %v1743_v19  ;;  %1921 = vmatpush3.bf16.msra.mxu0 %v2147_v29 }
  0x6c   : > { %1922 = vmatprep.subr.bf16.mxu0 %v2149_v32  ;;  %2017 = vmatpush3.bf16.msra.mxu1 %v2148_v30 }
  0x6d   : > { %2018 = vmatprep.subr.bf16.mxu1 %v2151_v36  ;;  %v696_v28 = vld [vmem:[#allocation2] sm:$0xf] }
  0x6f   : > { %1923 = vmatpush3.bf16.msra.mxu0 %v2150_v33 }
  0x70   : > { %1924 = vmatprep.subr.bf16.mxu0 %v2152_v37  ;;  %2019 = vmatpush3.bf16.msra.mxu1 %v2151_v36  ;;  %v700_v38 = vld [vmem:[#allocation2 + $0x8] sm:$0x1] }
  0x71   : > { %2020 = vmatprep.subr.bf16.mxu1 %v2154_v43 }
  0x72   : > { %562 = vmatmul.mubr.bf16.gmra.mxu0 %v2145_v17 }
  0x73   : > { %1925 = vmatpush3.bf16.msra.mxu0 %v2153_v42 }
  0x74   : > { %1926 = vmatprep.subr.bf16.mxu0 %v2155_v44  ;;  %2021 = vmatpush3.bf16.msra.mxu1 %v2154_v43 }
  0x75   : > { %2022 = vmatprep.subr.bf16.mxu1 %v2157_v46 }
  0x77   : > { %1927 = vmatpush3.bf16.msra.mxu0 %v2156_v45 }
  0x78   : > { %1928 = vmatprep.subr.bf16.mxu0 %v2158_v47  ;;  %2023 = vmatpush3.bf16.msra.mxu1 %v2157_v46 }
  0x79   : > { %2024 = vmatprep.subr.bf16.mxu1 %v2160_v49 }
  0x7b   : > { %1929 = vmatpush3.bf16.msra.mxu0 %v2159_v48 }
  0x7c   : > { %1930 = vmatprep.subr.bf16.mxu0 %v2161_v50  ;;  %2025 = vmatpush3.bf16.msra.mxu1 %v2160_v49 }
  0x7d   : > { %2026 = vmatprep.subr.bf16.mxu1 %v2163_v53 }
  0x7f   : > { %1931 = vmatpush3.bf16.msra.mxu0 %v2162_v52  ;;  %v703_v52 = vld [vmem:[#allocation2 + $0xc] sm:$0xf] }
  0x80   : > { %1932 = vmatprep.subr.bf16.mxu0 %v2164_v54  ;;  %2027 = vmatpush3.bf16.msra.mxu1 %v2163_v53 }
  0x81   : > { %2028 = vmatprep.subr.bf16.mxu1 %v2166_v56 }
  0x83   : > { %1933 = vmatpush3.bf16.msra.mxu0 %v2165_v55 }
  0x84   : > { %1934 = vmatprep.subr.bf16.mxu0 %v2167_v57  ;;  %2029 = vmatpush3.bf16.msra.mxu1 %v2166_v56 }
  0x85   : > { %2030 = vmatprep.subr.bf16.mxu1 %v2169_v59 }
  0x87   : > { %1935 = vmatpush3.bf16.msra.mxu0 %v2168_v58 }
  0x88   : > { %2031 = vmatpush3.bf16.msra.mxu1 %v2169_v59 }
 0x12a   : > { %v2014_v60 = vpop.f32.mrf.mxu1  ;;  %v1898_v61 = vpop.f32.mrf.mxu0 }
 0x12c   : > { %v1899_v62 = vpop.f32.mrf.mxu0  ;;  %v604_v0 = vpop.f32.mrf.mxu1 }
 0x12d   : > { %v1900_v1 = vadd.f32 %v1899_v62, %v1898_v61 }
 0x12e   : > { %v1901_v2 = vpop.f32.mrf.mxu0  ;;  %v2015_v4 = vpop.f32.mrf.mxu1 }
 0x12f   : > { %v556_v3 = vadd.f32 %v1900_v1, %v1746_v63 }
 0x130   : > { %v1902_v5 = vpop.f32.mrf.mxu0  ;;  %v607_v11 = vpop.f32.mrf.mxu1 }
 0x131   : > { %v605_v6 = vadd.f32 %v604_v0, %v556_v3  ;;  %v1903_v7 = vadd.f32 %v1902_v5, %v1901_v2 }
 0x132   : > { %v1904_v8 = vpop.f32.mrf.mxu0 }
 0x133   : > { %v619_v9 = vmax.f32 %v605_v6, 0.0  ;;  %v559_v10 = vadd.f32 %v1903_v7, %v1746_v63 }
 0x134   : > { %v1905_v12 = vpop.f32.mrf.mxu0 }
 0x135   : > { %v1857_v13 = vpack.c.bf16 %v619_v9, %v619_v9  ;;  %v608_v14 = vadd.f32 %v607_v11, %v559_v10  ;;  %v1906_v15 = vadd.f32 %v1905_v12, %v1904_v8 }
 0x136   : > { %v1907_v16 = vpop.f32.mrf.mxu0 }
 0x137   : > { %v655_v17 = vshrl.u32 %v1857_v13, 16  ;;  %v620_v18 = vmax.f32 %v608_v14, 0.0  ;;  %v564_v19 = vadd.f32 %v1906_v15, %v1746_v63  ;;  %v658_v21 = vshll.u32 %v1857_v13, 16 }
 0x138   : > { %v1908_v22 = vpop.f32.mrf.mxu0 }
 0x139   : > { %v657_v23 = vrot.slane %v655_v17, 7  ;;  %v1858_v24 = vpack.c.bf16 %v620_v18, %v620_v18  ;;  %v613_v25 = vadd.f32 %v2014_v60, %v564_v19  ;;  %v1909_v26 = vadd.f32 %v1908_v22, %v1907_v16  ;;  %v707_v60 = vld [vmem:[#allocation2 + $0x14] sm:$0x1] }
 0x13b   : > { %v660_v29 = vor.u32 %v658_v21, %v657_v23  ;;  %v663_v30 = vshrl.u32 %v1858_v24, 16  ;;  %v621_v32 = vmax.f32 %v613_v25, 0.0  ;;  %v567_v33 = vadd.f32 %v1909_v26, %v1746_v63 }
 0x13c   : > { %v666_v36 = vshll.u32 %v1858_v24, 16  ;;  %v661_v41 = vrot.slane %v657_v23, 4 }
 0x13d   : > { %v697_v34 = vsel %vm2549_vm12, %v660_v29, %v696_v28  ;;  %v665_v35 = vrot.slane %v663_v30, 7  ;;  %v1859_v39 = vpack.c.bf16 %v621_v32, %v621_v32  ;;  %v616_v40 = vadd.f32 %v2015_v4, %v567_v33 }
 0x13e   : > { %698 = vst [vmem:[#allocation2] sm:$0xf] %v697_v34 }
 0x13f   : > { %v668_v42 = vor.u32 %v666_v36, %v665_v35  ;;  %v670_v43 = vrot.slane %v665_v35, 4  ;;  %v672_v44 = vshrl.u32 %v1859_v39, 16  ;;  %v622_v45 = vmax.f32 %v616_v40, 0.0 }
 0x140   : > { %v675_v49 = vshll.u32 %v1859_v39, 16 }
 0x141   : > { %v669_v46 = vsel %vm2556_vm14, %v661_v41, %v668_v42  ;;  %v701_v47 = vsel %vm2524_vm8, %v670_v43, %v700_v38  ;;  %v674_v48 = vrot.slane %v672_v44, 7  ;;  %v1860_v50 = vpack.c.bf16 %v622_v45, %v622_v45 }
 0x142   : > { %699 = vst [vmem:[#allocation2 + $0x4] sm:$0xf] %v669_v46  ;;  %702 = vst [vmem:[#allocation2 + $0x8] sm:$0x1] %v701_v47 }
 0x143   : > { %v677_v53 = vor.u32 %v675_v49, %v674_v48  ;;  %v680_v54 = vshrl.u32 %v1860_v50, 16  ;;  %v683_v58 = vshll.u32 %v1860_v50, 16  ;;  %v678_v62 = vrot.slane %v674_v48, 4 }
 0x145   : > { %v714_v55 = vld [vmem:[#allocation2] sm:$0xf]  ;;  %v704_v56 = vsel %vm2549_vm12, %v677_v53, %v703_v52  ;;  %v682_v57 = vrot.slane %v680_v54, 7 }
 0x146   : > { %v721_v59 = vshrl.u32 %v714_v55, 16  ;;  %705 = vst [vmem:[#allocation2 + $0xc] sm:$0xf] %v704_v56  ;;  %v724_v61 = vshll.u32 %v714_v55, 16  ;;  %v768_v1 = vld [vmem:[#allocation2] sm:$0xe] }
 0x147   : > { %v685_v63 = vor.u32 %v683_v58, %v682_v57  ;;  %v687_v0 = vrot.slane %v682_v57, 4  ;;  %v1775_v12 = vrot.slane %v768_v1, 9  ;;  %v2172_v1 = vld [vmem:[#allocation7 + $0x1f8] sm:$0xff]  }
 0x148   : > { %v723_v2 = vrot.slane %v721_v59, 4  ;;  %v726_v5 = vrot.slane %v724_v61, 5  ;;  %1958 = vmatprep.subr.bf16.mxu0 %v2172_v1 }
 0x149   : > { %v715_v3 = vld [vmem:[#allocation2 + $0x4] sm:$0xf]  ;;  %v716_v4 = vld [vmem:[#allocation2 + $0x8] sm:$0x1]  ;;  %v686_v6 = vsel %vm2556_vm14, %v678_v62, %v685_v63  ;;  %v708_v7 = vsel %vm2524_vm8, %v687_v0, %v707_v60  ;;  %v1121_v63 = vld [vmem:[#allocation3] sm:$0x1] }
 0x14a   : > { %v778_v8 = vrot.slane %v715_v3, 5  ;;  %706 = vst [vmem:[#allocation2 + $0x10] sm:$0xf] %v686_v6  ;;  %709 = vst [vmem:[#allocation2 + $0x14] sm:$0x1] %v708_v7  ;;  %v727_v9 = vor.u32 %v726_v5, %v723_v2  ;;  %v730_v10 = vshll.u32 %v715_v3, 16 }
 0x14b   : > { %v734_v11 = vshrl.u32 %v715_v3, 16  ;;  %v781_v14 = vrot.slane %v716_v4, 5  ;;  %v740_v17 = vshll.u32 %v716_v4, 16  ;;  %v2170_v44 = vld [vmem:[#allocation2] sm:$0xff]   ;;  %v1122_v0 = vsel %vm2524_vm8, 0, %v1121_v63  ;;  %v2173_v2 = vld [vmem:[#allocation7 + $0x1b8] sm:$0xff]  }
 0x14c   : > { %v780_v13 = vrot.slane %v778_v8, 4  ;;  %v732_v15 = vrot.slane %v730_v10, 5  ;;  %v779_v18 = vsel %vm2491_vm4, %v1775_v12, %v778_v8  ;;  %v728_v23 = vrot.slane %v727_v9, 4  ;;  %1123 = vst [vmem:[#allocation3] sm:$0x1] %v1122_v0  ;;  %v2174_v3 = vld [vmem:[#allocation7 + $0x238] sm:$0xff]  }
 0x14d   : > { %v736_v16 = vrot.slane %v734_v11, 4  ;;  %v717_v21 = vld [vmem:[#allocation2 + $0xc] sm:$0xf]  ;;  %v742_v29 = vrot.slane %v740_v17, 5  ;;  %v2175_v4 = vld [vmem:[#allocation7 + $0x1f0] sm:$0xff]   ;;  %2036 = vmatprep.subr.bf16.mxu1 %v2174_v3  ;;  %v2181_v12 = vld [vmem:[#allocation7 + $0x1e0] sm:$0xff]  }
 0x14e   : > { %v782_v19 = vsel %vm2491_vm4, %v780_v13, %v781_v14  ;;  %v745_v25 = vshrl.u32 %v717_v21, 16  ;;  %v748_v26 = vshll.u32 %v717_v21, 16  ;;  %v769_v30 = vld [vmem:[#allocation2 + $0xc] sm:$0xe]  ;;  %v733_v36 = vsel %vm2502_vm5, %v728_v23, %v732_v15  ;;  %v2176_v5 = vld [vmem:[#allocation7 + $0x1b0] sm:$0xff]   ;;  %v2182_v13 = vld [vmem:[#allocation7 + $0x1a0] sm:$0xff]  }
 0x14f   : > { %v1781_v22 = vcombine.low %v779_v18, %v782_v19  ;;  %v737_v24 = vor.u32 %v736_v16, %v732_v15  ;;  %v1776_v45 = vrot.slane %v769_v30, 9  ;;  %v1124_v6 = vld [vmem:[#allocation3 + $0xc] sm:$0x1]  ;;  %v2177_v7 = vld [vmem:[#allocation7 + $0x230] sm:$0xff]   ;;  %v2178_v9 = vld [vmem:[#allocation7 + $0x1e8] sm:$0xff]  }
 0x150   : > { %v747_v34 = vrot.slane %v745_v25, 4  ;;  %v750_v35 = vrot.slane %v748_v26, 5  ;;  %v1125_v8 = vsel %vm2524_vm8, 0, %v1124_v6  ;;  %v2179_v10 = vld [vmem:[#allocation7 + $0x1a8] sm:$0xff]   ;;  %v2183_v14 = vld [vmem:[#allocation7 + $0x220] sm:$0xff]   ;;  %v2184_v15 = vld [vmem:[#allocation7 + $0x1d8] sm:$0xff]  }
 0x151   : > { %2032 = vmatprep.mubr.bf16.mxu1 %v1781_v22  ;;  %v738_v28 = vrot.slane %v737_v24, 4  ;;  %v718_v32 = vld [vmem:[#allocation2 + $0x10] sm:$0xf]  ;;  %v719_v33 = vld [vmem:[#allocation2 + $0x14] sm:$0x1]  ;;  %v2180_v11 = vld [vmem:[#allocation7 + $0x228] sm:$0xff]  }
 0x152   : > { %v785_v39 = vrot.slane %v718_v32, 5  ;;  %v754_v40 = vshll.u32 %v718_v32, 16  ;;  %v751_v42 = vor.u32 %v750_v35, %v747_v34  ;;  %v758_v43 = vshrl.u32 %v718_v32, 16  ;;  %v2171_v62 = vld [vmem:[#allocation2 + $0xc] sm:$0xff]   ;;  %1126 = vst [vmem:[#allocation3 + $0xc] sm:$0x1] %v1125_v8 }
 0x153   : > { %v743_v38 = vsel %vm2502_vm5, %v738_v28, %v742_v29  ;;  %v788_v47 = vrot.slane %v719_v33, 5  ;;  %v764_v50 = vshll.u32 %v719_v33, 16  ;;  %v2185_v16 = vld [vmem:[#allocation7 + $0x198] sm:$0xff]   ;;  %v2187_v18 = vld [vmem:[#allocation7 + $0x1d0] sm:$0xff]   ;;  %v2190_v22 = vld [vmem:[#allocation7 + $0x1c8] sm:$0xff]  }
 0x154   : > { %v1779_v41 = vcombine.low %v733_v36, %v743_v38  ;;  %v787_v46 = vrot.slane %v785_v39, 4  ;;  %v756_v48 = vrot.slane %v754_v40, 5  ;;  %v760_v49 = vrot.slane %v758_v43, 4  ;;  %v2186_v17 = vld [vmem:[#allocation7 + $0x218] sm:$0xff]   ;;  %v2188_v19 = vld [vmem:[#allocation7 + $0x190] sm:$0xff]   ;;  %v2191_v23 = vld [vmem:[#allocation7 + $0x188] sm:$0xff]  }
 0x155   : > { %v786_v52 = vsel %vm2491_vm4, %v1776_v45, %v785_v39  ;;  %v752_v55 = vrot.slane %v751_v42, 4  ;;  %v766_v58 = vrot.slane %v764_v50, 5  ;;  %v2189_v21 = vld [vmem:[#allocation7 + $0x210] sm:$0xff]   ;;  %v2192_v24 = vld [vmem:[#allocation7 + $0x208] sm:$0xff]   ;;  %v2193_v25 = vld [vmem:[#allocation7 + $0x1c0] sm:$0xff]  }
 0x156   : > { %1051 = vmatprep.mubr.bf16.mxu0 %v1779_v41  ;;  %v789_v53 = vsel %vm2491_vm4, %v787_v46, %v788_v47  ;;  %v761_v56 = vor.u32 %v760_v49, %v756_v48  ;;  %v2194_v26 = vld [vmem:[#allocation7 + $0x180] sm:$0xff]  }
 0x157   : > { %1052 = vmatmul.mubr.bf16.vlgmr.msra.gmra.mxu0 %v2170_v44  ;;  %v1782_v54 = vcombine.low %v786_v52, %v789_v53  ;;  %v757_v59 = vsel %vm2502_vm5, %v752_v55, %v756_v48  ;;  %v2195_v28 = vld [vmem:[#allocation7 + $0x200] sm:$0xff]  }
 0x158   : > { %v762_v57 = vrot.slane %v761_v56, 4  ;;  %1959 = vmatpush3.bf16.msra.mxu0 %v2173_v2  ;;  %v1784_v32 = vld [vmem:[%s2676_s2 + $0x1] ss:$0 sm:$0xff]  ;;  %v1189_v6 = vld [vmem:[#allocation3 + $0x8] sm:$0x1] }
 0x159   : > { %2033 = vmatmul.mubr.bf16.vlgmr.msra.gmra.mxu1 %v1782_v54  ;;  %1960 = vmatprep.subr.bf16.mxu0 %v2175_v4 }
 0x15a   : > { %v767_v60 = vsel %vm2502_vm5, %v762_v57, %v766_v58  ;;  %2037 = vmatpush3.bf16.msra.mxu1 %v2174_v3 }
 0x15b   : > { %v1780_v61 = vcombine.low %v757_v59, %v767_v60  ;;  %2038 = vmatprep.subr.bf16.mxu1 %v2177_v7  ;;  %v1185_v60 = vld [vmem:[#allocation3] sm:$0xf] }
 0x15c   : > { %1961 = vmatpush3.bf16.msra.mxu0 %v2176_v5 }
 0x15d   : > { %1059 = vmatprep.mubr.bf16.mxu0 %v1780_v61  ;;  %1962 = vmatprep.subr.bf16.mxu0 %v2178_v9 }
 0x15e   : > { %2039 = vmatpush3.bf16.msra.mxu1 %v2177_v7 }
 0x15f   : > { %1060 = vmatmul.mubr.bf16.gmra.mxu0 %v2171_v62  ;;  %2040 = vmatprep.subr.bf16.mxu1 %v2180_v11 }
 0x160   : > { %1963 = vmatpush3.bf16.msra.mxu0 %v2179_v10 }
 0x161   : > { %1964 = vmatprep.subr.bf16.mxu0 %v2181_v12 }
 0x162   : > { %2041 = vmatpush3.bf16.msra.mxu1 %v2180_v11 }
 0x163   : > { %2042 = vmatprep.subr.bf16.mxu1 %v2183_v14 }
 0x164   : > { %1965 = vmatpush3.bf16.msra.mxu0 %v2182_v13 }
 0x165   : > { %1966 = vmatprep.subr.bf16.mxu0 %v2184_v15 }
 0x166   : > { %2043 = vmatpush3.bf16.msra.mxu1 %v2183_v14 }
 0x167   : > { %2044 = vmatprep.subr.bf16.mxu1 %v2186_v17 }
 0x168   : > { %1967 = vmatpush3.bf16.msra.mxu0 %v2185_v16 }
 0x169   : > { %1968 = vmatprep.subr.bf16.mxu0 %v2187_v18 }
 0x16a   : > { %2045 = vmatpush3.bf16.msra.mxu1 %v2186_v17 }
 0x16b   : > { %2046 = vmatprep.subr.bf16.mxu1 %v2189_v21 }
 0x16c   : > { %1969 = vmatpush3.bf16.msra.mxu0 %v2188_v19  ;;  %v1192_v19 = vld [vmem:[#allocation3 + $0xc] sm:$0xf] }
 0x16d   : > { %1970 = vmatprep.subr.bf16.mxu0 %v2190_v22 }
 0x16e   : > { %2047 = vmatpush3.bf16.msra.mxu1 %v2189_v21 }
 0x16f   : > { %2048 = vmatprep.subr.bf16.mxu1 %v2192_v24 }
 0x170   : > { %1971 = vmatpush3.bf16.msra.mxu0 %v2191_v23 }
 0x171   : > { %1972 = vmatprep.subr.bf16.mxu0 %v2193_v25 }
 0x172   : > { %2049 = vmatpush3.bf16.msra.mxu1 %v2192_v24 }
 0x173   : > { %2050 = vmatprep.subr.bf16.mxu1 %v2195_v28 }
 0x174   : > { %1973 = vmatpush3.bf16.msra.mxu0 %v2194_v26 }
 0x176   : > { %2051 = vmatpush3.bf16.msra.mxu1 %v2195_v28 }
 0x217   : > { %v1936_v29 = vpop.f32.mrf.mxu0 }
 0x219   : > { %v1937_v30 = vpop.f32.mrf.mxu0  ;;  %v2034_v34 = vpop.f32.mrf.mxu1 }
 0x21a   : > { %v1938_v33 = vadd.f32 %v1937_v30, %v1936_v29  ;;  %v1196_v29 = vld [vmem:[#allocation3 + $0x14] sm:$0x1] }
 0x21b   : > { %v1939_v35 = vpop.f32.mrf.mxu0  ;;  %v1102_v38 = vpop.f32.mrf.mxu1 }
 0x21c   : > { %v1054_v36 = vadd.f32 %v1938_v33, %v1784_v32 }
 0x21d   : > { %v1940_v39 = vpop.f32.mrf.mxu0  ;;  %v2035_v42 = vpop.f32.mrf.mxu1 }
 0x21e   : > { %v1103_v40 = vadd.f32 %v1102_v38, %v1054_v36  ;;  %v1941_v41 = vadd.f32 %v1940_v39, %v1939_v35 }
 0x21f   : > { %v1942_v44 = vpop.f32.mrf.mxu0  ;;  %v1105_v46 = vpop.f32.mrf.mxu1 }
 0x220   : > { %v1117_v43 = vmax.f32 %v1103_v40, 0.0  ;;  %v1057_v45 = vadd.f32 %v1941_v41, %v1784_v32 }
 0x221   : > { %v1943_v49 = vpop.f32.mrf.mxu0 }
 0x222   : > { %v1861_v47 = vpack.c.bf16 %v1117_v43, %v1117_v43  ;;  %v1106_v48 = vadd.f32 %v1105_v46, %v1057_v45  ;;  %v1944_v50 = vadd.f32 %v1943_v49, %v1942_v44 }
 0x223   : > { %v1945_v54 = vpop.f32.mrf.mxu0 }
 0x224   : > { %v1146_v52 = vshrl.u32 %v1861_v47, 16  ;;  %v1118_v53 = vmax.f32 %v1106_v48, 0.0  ;;  %v1062_v55 = vadd.f32 %v1944_v50, %v1784_v32  ;;  %v1149_v57 = vshll.u32 %v1861_v47, 16 }
 0x225   : > { %v1946_v59 = vpop.f32.mrf.mxu0 }
 0x226   : > { %v1148_v56 = vrot.slane %v1146_v52, 7  ;;  %v1862_v58 = vpack.c.bf16 %v1118_v53, %v1118_v53  ;;  %v1111_v61 = vadd.f32 %v2034_v34, %v1062_v55  ;;  %v1947_v62 = vadd.f32 %v1946_v59, %v1945_v54 }
 0x228   : > { %v1151_v63 = vor.u32 %v1149_v57, %v1148_v56  ;;  %v1154_v0 = vshrl.u32 %v1862_v58, 16  ;;  %v1119_v1 = vmax.f32 %v1111_v61, 0.0  ;;  %v1065_v2 = vadd.f32 %v1947_v62, %v1784_v32 }
 0x229   : > { %v1157_v5 = vshll.u32 %v1862_v58, 16  ;;  %v1152_v9 = vrot.slane %v1148_v56, 4 }
 0x22a   : > { %v1186_v3 = vsel %vm2549_vm12, %v1151_v63, %v1185_v60  ;;  %v1156_v4 = vrot.slane %v1154_v0, 7  ;;  %v1863_v7 = vpack.c.bf16 %v1119_v1, %v1119_v1  ;;  %v1114_v8 = vadd.f32 %v2035_v42, %v1065_v2 }
 0x22b   : > { %1187 = vst [vmem:[#allocation3] sm:$0xf] %v1186_v3 }
 0x22c   : > { %v1159_v10 = vor.u32 %v1157_v5, %v1156_v4  ;;  %v1161_v11 = vrot.slane %v1156_v4, 4  ;;  %v1163_v12 = vshrl.u32 %v1863_v7, 16  ;;  %v1120_v13 = vmax.f32 %v1114_v8, 0.0 }
 0x22d   : > { %v1166_v17 = vshll.u32 %v1863_v7, 16 }
 0x22e   : > { %v1160_v14 = vsel %vm2556_vm14, %v1152_v9, %v1159_v10  ;;  %v1190_v15 = vsel %vm2524_vm8, %v1161_v11, %v1189_v6  ;;  %v1165_v16 = vrot.slane %v1163_v12, 7  ;;  %v1864_v18 = vpack.c.bf16 %v1120_v13, %v1120_v13 }
 0x22f   : > { %1188 = vst [vmem:[#allocation3 + $0x4] sm:$0xf] %v1160_v14  ;;  %1191 = vst [vmem:[#allocation3 + $0x8] sm:$0x1] %v1190_v15 }
 0x230   : > { %v1168_v21 = vor.u32 %v1166_v17, %v1165_v16  ;;  %v1171_v22 = vshrl.u32 %v1864_v18, 16  ;;  %v1174_v26 = vshll.u32 %v1864_v18, 16  ;;  %v1169_v32 = vrot.slane %v1165_v16, 4 }
 0x232   : > { %v1203_v23 = vld [vmem:[#allocation3] sm:$0xf]  ;;  %v1193_v24 = vsel %vm2549_vm12, %v1168_v21, %v1192_v19  ;;  %v1173_v25 = vrot.slane %v1171_v22, 7 }
 0x233   : > { %v1210_v28 = vshrl.u32 %v1203_v23, 16  ;;  %1194 = vst [vmem:[#allocation3 + $0xc] sm:$0xf] %v1193_v24  ;;  %v1213_v30 = vshll.u32 %v1203_v23, 16  ;;  %v1257_v35 = vld [vmem:[#allocation3] sm:$0xe] }
 0x234   : > { %v1176_v33 = vor.u32 %v1174_v26, %v1173_v25  ;;  %v1178_v34 = vrot.slane %v1173_v25, 4  ;;  %v1813_v46 = vrot.slane %v1257_v35, 9 }
 0x235   : > { %v1212_v36 = vrot.slane %v1210_v28, 4  ;;  %v1215_v40 = vrot.slane %v1213_v30, 5  ;;  %v1822_v30 = vld [vmem:[%s2676_s2 + $0x2] ss:$0 sm:$0xff] }
 0x236   : > { %v1204_v38 = vld [vmem:[#allocation3 + $0x4] sm:$0xf]  ;;  %v1205_v39 = vld [vmem:[#allocation3 + $0x8] sm:$0x1]  ;;  %v1177_v41 = vsel %vm2556_vm14, %v1169_v32, %v1176_v33  ;;  %v1197_v27 = vsel %vm2524_vm8, %v1178_v34, %v1196_v29 }
 0x237   : > { %v1267_v42 = vrot.slane %v1204_v38, 5  ;;  %1195 = vst [vmem:[#allocation3 + $0x10] sm:$0xf] %v1177_v41  ;;  %1198 = vst [vmem:[#allocation3 + $0x14] sm:$0x1] %v1197_v27  ;;  %v1216_v43 = vor.u32 %v1215_v40, %v1212_v36  ;;  %v1219_v44 = vshll.u32 %v1204_v38, 16 }
 0x238   : > { %v1223_v45 = vshrl.u32 %v1204_v38, 16  ;;  %v1270_v48 = vrot.slane %v1205_v39, 5  ;;  %v1229_v52 = vshll.u32 %v1205_v39, 16  ;;  %v2196_v9 = vld [vmem:[#allocation3] sm:$0xff]  }
 0x239   : > { %v1269_v47 = vrot.slane %v1267_v42, 4  ;;  %v1221_v49 = vrot.slane %v1219_v44, 5  ;;  %v1268_v53 = vsel %vm2491_vm4, %v1813_v46, %v1267_v42  ;;  %v1217_v55 = vrot.slane %v1216_v43, 4 }
 0x23a   : > { %v1225_v50 = vrot.slane %v1223_v45, 4  ;;  %v1206_v20 = vld [vmem:[#allocation3 + $0xc] sm:$0xf]  ;;  %v1231_v60 = vrot.slane %v1229_v52, 5 }
 0x23b   : > { %v1271_v37 = vsel %vm2491_vm4, %v1269_v47, %v1270_v48  ;;  %v1234_v57 = vshrl.u32 %v1206_v20, 16  ;;  %v1237_v58 = vshll.u32 %v1206_v20, 16  ;;  %v1258_v61 = vld [vmem:[#allocation3 + $0xc] sm:$0xe]  ;;  %v1222_v2 = vsel %vm2502_vm5, %v1217_v55, %v1221_v49 }
 0x23c   : > { %v1819_v54 = vcombine.low %v1268_v53, %v1271_v37  ;;  %v1226_v56 = vor.u32 %v1225_v50, %v1221_v49  ;;  %v1814_v10 = vrot.slane %v1258_v61, 9 }
 0x23d   : > { %v1236_v0 = vrot.slane %v1234_v57, 4  ;;  %v1239_v1 = vrot.slane %v1237_v58, 5 }
 0x23e   : > { %2052 = vmatprep.mubr.bf16.mxu1 %v1819_v54  ;;  %v1227_v59 = vrot.slane %v1226_v56, 4  ;;  %v1207_v62 = vld [vmem:[#allocation3 + $0x10] sm:$0xf]  ;;  %v1208_v63 = vld [vmem:[#allocation3 + $0x14] sm:$0x1] }
 0x23f   : > { %v1274_v4 = vrot.slane %v1207_v62, 5  ;;  %v1243_v5 = vshll.u32 %v1207_v62, 16  ;;  %v1240_v7 = vor.u32 %v1239_v1, %v1236_v0  ;;  %v1247_v8 = vshrl.u32 %v1207_v62, 16  ;;  %v2197_v28 = vld [vmem:[#allocation3 + $0xc] sm:$0xff]  }
 0x240   : > { %v1232_v3 = vsel %vm2502_vm5, %v1227_v59, %v1231_v60  ;;  %v1277_v12 = vrot.slane %v1208_v63, 5  ;;  %v1253_v15 = vshll.u32 %v1208_v63, 16 }
 0x241   : > { %v1817_v6 = vcombine.low %v1222_v2, %v1232_v3  ;;  %v1276_v11 = vrot.slane %v1274_v4, 4  ;;  %v1245_v13 = vrot.slane %v1243_v5, 5  ;;  %v1249_v14 = vrot.slane %v1247_v8, 4 }
 0x242   : > { %v1275_v16 = vsel %vm2491_vm4, %v1814_v10, %v1274_v4  ;;  %v1241_v19 = vrot.slane %v1240_v7, 4  ;;  %v1255_v23 = vrot.slane %v1253_v15, 5 }
 0x243   : > { %1540 = vmatprep.mubr.bf16.mxu0 %v1817_v6  ;;  %v1278_v17 = vsel %vm2491_vm4, %v1276_v11, %v1277_v12  ;;  %v1250_v21 = vor.u32 %v1249_v14, %v1245_v13 }
 0x244   : > { %1541 = vmatmul.mubr.bf16.vlgmr.msra.gmra.mxu0 %v2196_v9  ;;  %v1820_v18 = vcombine.low %v1275_v16, %v1278_v17  ;;  %v1246_v24 = vsel %vm2502_vm5, %v1241_v19, %v1245_v13 }
 0x245   : > { %v1251_v22 = vrot.slane %v1250_v21, 4 }
 0x246   : > { %2053 = vmatmul.mubr.bf16.vlgmr.msra.gmra.mxu1 %v1820_v18 }
 0x247   : > { %v1256_v25 = vsel %vm2502_vm5, %v1251_v22, %v1255_v23 }
 0x248   : > { %v1818_v26 = vcombine.low %v1246_v24, %v1256_v25 }
 0x24a   : > { %1548 = vmatprep.mubr.bf16.mxu0 %v1818_v26 }
 0x24c   : > { %1549 = vmatmul.mubr.bf16.gmra.mxu0 %v2197_v28 }
 0x304   : > { %v1974_v29 = vpop.f32.mrf.mxu0 }
 0x306   : > { %v1975_v31 = vpop.f32.mrf.mxu0  ;;  %v2054_v33 = vpop.f32.mrf.mxu1 }
 0x307   : > { %v1976_v32 = vadd.f32 %v1975_v31, %v1974_v29 }
 0x308   : > { %v1977_v34 = vpop.f32.mrf.mxu0  ;;  %v1591_v36 = vpop.f32.mrf.mxu1 }
 0x309   : > { %v1543_v35 = vadd.f32 %v1976_v32, %v1822_v30 }
 0x30a   : > { %v1978_v38 = vpop.f32.mrf.mxu0  ;;  %v2055_v51 = vpop.f32.mrf.mxu1 }
 0x30b   : > { %v1979_v39 = vadd.f32 %v1978_v38, %v1977_v34  ;;  %v1592_v40 = vadd.f32 %v1591_v36, %v1543_v35 }
 0x30c   : > { %v1980_v41 = vpop.f32.mrf.mxu0  ;;  %v1594_v42 = vpop.f32.mrf.mxu1 }
 0x30d   : > { %v1546_v27 = vadd.f32 %v1979_v39, %v1822_v30  ;;  %v1606_v46 = vmax.f32 %v1592_v40, 0.0 }
 0x30e   : > { %v1981_v44 = vpop.f32.mrf.mxu0 }
 0x30f   : > { %v1595_v43 = vadd.f32 %v1594_v42, %v1546_v27  ;;  %v1982_v45 = vadd.f32 %v1981_v44, %v1980_v41 }
 0x310   : > { %v1983_v48 = vpop.f32.mrf.mxu0 }
 0x311   : > { %v1607_v47 = vmax.f32 %v1595_v43, 0.0  ;;  %v1551_v49 = vadd.f32 %v1982_v45, %v1822_v30 }
 0x312   : > { %v1984_v52 = vpop.f32.mrf.mxu0 }
 0x313   : > { %v1874_v50 = vpack.c.bf16 %v1607_v47, %v1606_v46  ;;  %v1985_v53 = vadd.f32 %v1984_v52, %v1983_v48  ;;  %v1600_v37 = vadd.f32 %v2054_v33, %v1551_v49 }
 0x315   : > { %1875 = vst [vmem:[%s204_s25] sm:$0xff] %v1874_v50   ;;  %v1554_v20 = vadd.f32 %v1985_v53, %v1822_v30  ;;  %v1608_v55 = vmax.f32 %v1600_v37, 0.0 }
 0x317   : > { %v1603_v54 = vadd.f32 %v2055_v51, %v1554_v20 }
 0x319   : > { %v1609_v56 = vmax.f32 %v1603_v54, 0.0 }
 0x31b   : > { %v1879_v57 = vpack.c.bf16 %v1609_v56, %v1608_v55 }
 0x31d   : > { %1881 = vst [vmem:[%s204_s25 + $0x8] sm:$0xff] %v1879_v57  }
 0x31e   : > { %2265 = shalt.err (!%p2262_p0)
}
 0x31f   : > { %s2266_s18 = scalar_lea.hbm %s2631_s17, 256  ;;  %s2270_s29 = scalar_lea.hbm %s2677_s3, 512 }
 0x320   : > { %p2267_p11 = scmp.ne.s32.totalorder %s2631_s17, %s2266_s18  ;;  %p2271_p4 = scmp.lt.s32.totalorder %s2631_s17, %s2677_s3 }
 0x321   : > { %p2272_p6 = scmp.lt.s32.totalorder %s2270_s29, %s2266_s18 }
 0x322   : > { %p2268_p2 = pnand %p2267_p11, %p2705_p5 }
 0x323   : > { %p2273_p8 = por %p2272_p6, %p2271_p4 }
 0x324   : > { %p2269_p1 = pneg %p2268_p2 }
 0x326   : > { %p2274_p3 = pnand %p2273_p8, %p2269_p1 }
 0x328   : > { %2277 = shalt.err (!%p2274_p3)
}
 0x329   : > { %s2327_s23 = smov 64   ;;  %s2328_s25 = smov 4  }
 0x32a   : > { %2065 = dma.vmem_to_hbm [thread:$0]  (%p2705_p5), %s2626_s8, 256, %s2631_s17, %s1631_s22, %s2327_s23, %s2327_s23, %s2328_s25  }
 0x32b PF: > { %s1660_s11 = sand.u32 1, %s2308_s12   ;;  %p2706_p7 = scmp.ne.s32.totalorder %s2683_s19, 0 }
 0x32c   : > { %p2707_p9 = scmp.ge.s32.totalorder %s2320_s15, 2  ;;  %s1661_s7 = scalar_lea.sflag [#allocation6], %s1660_s11 }
 0x32e   : > { %p2076_p10 = pnand %p2707_p9, %p2706_p7 }
 0x330   : > { %p2077_p12 = pneg %p2076_p10 }
 0x332   : > { %2303 = dma.done.wait (%p2077_p12), %s1661_s7, 256  }
 0x333   : > { %2305 = vsyncadd (%p2077_p12), %s1661_s7, 4294967040  ;;  %p17_p13 = scmp.ge.s32.totalorder %s2403_s24, 4   ;;  %s2708_s12 = smov %s2312_s13 }
 0x334   : > { %s2709_s13 = smov %s2316_s14  ;;  %s2710_s14 = smov %s2423_s5 }
 0x335   : > { %s2711_s15 = smov %s2403_s24  ;;  %19 = sbr.rel (!%p17_p13) target bundleno = 6 (0x6), region = 85 }
 0x33a   :  { %1666 = vsyncpa [#allocation5], 1 }
 0x33b   :  { %1668 = vsyncpa [#allocation5 + $0x1], 1 }
 0x33c   :  { %1669 = vsyncpa [#allocation8], 1 }
 0x33d   :  { %1670 = vsyncpa [#allocation6], 1 }
 0x33e   :  { %1672 = vsyncpa [#allocation6 + $0x1], 1 }

// kernel: tpu_custom_call.1
= control target key start
LH: loop header
LB: loop body
LE: loop exit
PB: predicated region body
PF: predicated region fallthrough
CT: control target
= control target key end

     0   :  { %8 = vsyncpa [#allocation5], 0  ;;  %s2674_s0 = inlined_call_operand.hbm [shape: bf16[4,24,128], index: 0, kind: input, shape index: {}]   ;;  %s2675_s1 = inlined_call_operand.hbm [shape: bf16[3,384,128], index: 1, kind: input, shape index: {}]   ;;  %s2676_s2 = inlined_call_operand.vmem [shape: f32[3,1,128], index: 2, kind: input, shape index: {}]   ;;  %s2677_s3 = inlined_call_operand.hbm [shape: bf16[4,16,128], index: 3, kind: output, shape index: {}]  }
   0x1   :  { %10 = vsyncpa [#allocation5 + $0x1], 0 }
   0x2   :  { %11 = vsyncpa [#allocation8], 0 }
   0x3   :  { %12 = vsyncpa [#allocation6], 0 }
   0x4   :  { %14 = vsyncpa [#allocation6 + $0x1], 0  ;;  %s2349_s12 = smov 0   ;;  %s2351_s13 = smov 0  }
   0x5   :  { %s2353_s14 = smov 0   ;;  %s2355_s15 = smov 0  }
   0x6 LB: > { %s2370_s16 = sadd.s32 4294967295, %s2320_s15   ;;  %s1728_s17 = sadd.s32 4294967294, %s2320_s15   ;;  %s2320_s15 = sphi %s2355_s15, %s2711_s15   ;;  %s2316_s14 = sphi %s2353_s14, %s2710_s14   ;;  %s2312_s13 = sphi %s2351_s13, %s2709_s13   ;;  %s2308_s12 = sphi %s2349_s12, %s2708_s12  }
   0x7   : > { %p40_p0 = scmp.ne.s32.totalorder %s2312_s13, %s2308_s12  ;;  %p2678_p1 = scmp.eq.s32.totalorder %s2370_s16, 0 }
   0x8   : > { %p112_p3 = scmp.eq.s32.totalorder %s1728_s17, 1  ;;  %p1729_p5 = scmp.ge.s32.totalorder %s2320_s15, 1 }
   0x9   : > { %p2379_p4 = por %p2678_p1, %p40_p0  ;;  %p119_p7 = scmp.lt.s32.totalorder %s2320_s15, 3 }
   0xa   : > { %p2384_p6 = por %p112_p3, %p40_p0  ;;  %s2322_s21 = smov [#allocation7]  }
   0xb   : > { %s2682_s18 = scalar_select %p2379_p4, 1, 0 }
   0xc   : > { %s2683_s19 = scalar_select %p2384_p6, 1, 0 }
   0xd   : > { %p2389_p8 = pnand %p1729_p5, %p119_p7  ;;  %s131_s22 = sshll.u32 %s2322_s21, 4  ;;  %s132_s22 = int_to_ptr.vmem [resolvable:$true] %s131_s22 }
   0xe   : > { %s2403_s24 = sadd.s32 1, %s2320_s15   ;;  %s27_s25 = sadd.s32 1, %s2316_s14 }
   0xf   : > { %s2684_s20 = scalar_select %p2389_p8, 1, 0 }
  0x10   : > { %p2067_p9 = pneg %p2389_p8  ;;  %s24_s26 = ssub.s32 %s2320_s15, %s2403_s24 }
  0x11   : > { %s2209_s27 = scalar_lea.vmem %s132_s22, 9216  ;;  %p2217_p5 = scmp.lt.s32.totalorder %s132_s22, %s132_s22 }
  0x12   : > { %p2398_p11 = pnand %p2067_p9, %p2678_p1  ;;  %p2210_p13 = scmp.ne.s32.totalorder %s132_s22, %s2209_s27 }
  0x13   : > { %p2218_p7 = scmp.lt.s32.totalorder %s2209_s27, %s2209_s27 }
  0x14   : > { %p2200_p12 = pneg %p2398_p11 }
  0x15   : > { %p2219_p10 = por %p2218_p7, %p2217_p5 }
  0x16   : > { %p2212_p0 = pnand %p2210_p13, %p2200_p12 }
  0x18   : > { %p2213_p3 = pneg %p2212_p0 }
  0x1a   : > { %p2220_p2 = pnand %p2219_p10, %p2213_p3 }
  0x1c   : > { %2223 = shalt.err (!%p2220_p2)
}
  0x1d   : > { %s2323_s28 = smov 64   ;;  %s2324_s29 = smov 4  }
  0x1e   : > { %2070 = dma.hbm_to_vmem [thread:$0]  (!%p2398_p11), %s2675_s1, 9216, %s132_s22, [#allocation8], %s2323_s28, %s2323_s28, %s2324_s29  }
  0x1f   : > { %p25_p2 = scmp.eq.s32.totalorder %s24_s26, 0  ;;  %p34_p9 = scmp.ne.s32.totalorder %s2316_s14, %s2312_s13 }
  0x20   : > { %p35_p10 = scmp.eq.s32.totalorder %s2320_s15, 0  ;;  %p2080_p12 = scmp.lt.s32.totalorder %s2320_s15, 2 }
  0x21   : > { %s2423_s5 = scalar_select %p25_p2, %s2316_s14, %s27_s25  }
  0x22   : > { %p36_p13 = por %p35_p10, %p34_p9  ;;  %p2686_p0 = scmp.eq.s32.totalorder %s2370_s16, 1 }
  0x23   : > { %s148_s7 = sand.u32 1, %s2316_s14   ;;  %s2057_s8 = smul.u32 384, %s2320_s15 }
  0x24   : > { %p2427_p3 = por %p2686_p0, %p34_p9  ;;  %s2056_s9 = smul.u32 24, %s148_s7 }
  0x25   : > { %p2433_p5 = pnand %p2080_p12, %p36_p13  ;;  %s2440_s21 = scalar_lea.hbm %s2674_s0, %s2057_s8 }
  0x26   : > { %s2687_s6 = scalar_select %p2427_p3, 1, 0 }
  0x27   : > { %s152_s22 = scalar_lea.vmem [#allocation4], %s2056_s9  ;;  %s2444_s25 = scalar_lea.sflag [#allocation5], %s148_s7 }
  0x28   : > { %s160_s23 = sshll.u32 %s152_s22, 4  ;;  %s2224_s26 = scalar_lea.hbm %s2440_s21, 384  ;;  %s2442_s23 = int_to_ptr.vmem [resolvable:$true] %s160_s23 }
  0x29   : > { %p2225_p11 = scmp.ne.s32.totalorder %s2440_s21, %s2224_s26  ;;  %p2226_p7 = pneg %p2433_p5 }
  0x2a   : > { %s2229_s4 = scalar_lea.hbm %s2674_s0, 768  ;;  %p2230_p10 = scmp.lt.s32.totalorder %s2440_s21, %s2674_s0 }
  0x2b   : > { %p2227_p2 = pnand %p2226_p7, %p2225_p11  ;;  %p2231_p12 = scmp.lt.s32.totalorder %s2229_s4, %s2224_s26 }
  0x2d   : > { %p2228_p9 = pneg %p2227_p2  ;;  %p2232_p13 = por %p2231_p12, %p2230_p10 }
  0x2f   : > { %p2233_p0 = pnand %p2232_p13, %p2228_p9 }
  0x31   : > { %2236 = shalt.err (!%p2233_p0)
}
  0x32   : > { %s2237_s7 = scalar_lea.vmem %s2442_s23, 384  ;;  %s2325_s9 = smov [#allocation4]  }
  0x33   : > { %p2238_p1 = scmp.ne.s32.totalorder %s2442_s23, %s2237_s7  ;;  %s2242_s17 = sshll.u32 %s2325_s9, 4  ;;  %s2243_s17 = int_to_ptr.vmem [resolvable:$false] %s2242_s17 }
  0x34   : > { %s2244_s22 = scalar_lea.vmem %s2243_s17, 768  ;;  %p2245_p2 = scmp.lt.s32.totalorder %s2442_s23, %s2243_s17 }
  0x35   : > { %p2240_p6 = pnand %p2238_p1, %p2226_p7  ;;  %p2246_p3 = scmp.lt.s32.totalorder %s2244_s22, %s2237_s7 }
  0x37   : > { %p2241_p11 = pneg %p2240_p6  ;;  %p2247_p4 = por %p2246_p3, %p2245_p2 }
  0x39   : > { %p2248_p8 = pnand %p2247_p4, %p2241_p11 }
  0x3b   : > { %2251 = shalt.err (!%p2248_p8)
}
  0x3c   : > { %2074 = dma.hbm_to_vmem [thread:$0]  (!%p2433_p5), %s2440_s21, 384, %s2442_s23, %s2444_s25, %s2323_s28, %s2323_s28, %s2324_s29  }
  0x3d   : > { %p2689_p1 = scmp.ne.s32.totalorder %s2684_s20, 0 }
  0x3e   : > { %s2471_s26 = sand.u32 (!%p2689_p1), 1, %s2312_s13   ;;  %p2690_p4 = scmp.ne.s32.totalorder (!%p2689_p1), %s2682_s18, 0 }
  0x3f   : > { %172 = sbr.rel (%p2689_p1) target bundleno = 811 (0x32b), region = 32  ;;  %s175_s30 = scalar_lea.sflag (!%p2689_p1), [#allocation5], %s2471_s26 }
  0x40   : > { %s2058_s27 = smul.u32 (!%p2689_p1), 24, %s2471_s26 }
  0x42   : > { %s2475_s4 = scalar_lea.vmem (!%p2689_p1), [#allocation4], %s2058_s27 }
  0x44   : > { %2295 = dma.done.wait (%p2690_p4), %s175_s30, 384  }
  0x45   : > { %2297 = vsyncadd (%p2690_p4), %s175_s30, 4294966912  ;;  %p2691_p6 = scmp.eq.s32.totalorder %s2370_s16, 0 }
  0x47   : > { %2299 = dma.done.wait (%p2691_p6), [#allocation8], 9216   ;;  %p2692_p8 = pmov %p2691_p6 }
  0x48   : > { %v2120_v0 = vld [vmem:[#allocation7 + $0x78] sm:$0xff]   ;;  %v2123_v3 = vld [vmem:[#allocation7 + $0x70] sm:$0xff]   ;;  %v2126_v6 = vld [vmem:[#allocation7 + $0x68] sm:$0xff]   ;;  %vm218_vm0 = vsmask.f32 3328  ;;  %vm277_vm2 = vcmask 1042432  }
  0x49   : > { %2301 = vsyncadd (%p2692_p8), [#allocation8], 4294958080  ;;  %v2121_v1 = vld [vmem:[#allocation7 + $0xb8] sm:$0xff]   ;;  %1882 = vmatprep.subr.bf16.mxu0 %v2120_v0  ;;  %v2124_v4 = vld [vmem:[#allocation7 + $0xb0] sm:$0xff]   ;;  %vm219_vm1 = vsmask.f32 7440 }
  0x4a   : > { %v2122_v2 = vld [vmem:[#allocation7 + $0x38] sm:$0xff]   ;;  %1996 = vmatprep.subr.bf16.mxu1 %v2121_v1  ;;  %v2125_v5 = vld [vmem:[#allocation7 + $0x30] sm:$0xff]   ;;  %v2127_v7 = vld [vmem:[#allocation7 + $0xa8] sm:$0xff]   ;;  %vm278_vm3 = vcmask 1046532   ;;  %vm623_vm6 = vcmask 1040384   ;;  %vm694_vm11 = vcmask 1043456  }
  0x4b   : > { %1883 = vmatpush3.bf16.msra.mxu0 %v2122_v2  ;;  %1997 = vmatpush3.bf16.msra.mxu1 %v2121_v1  ;;  %v2128_v8 = vld [vmem:[#allocation7 + $0x28] sm:$0xff]   ;;  %v2129_v9 = vld [vmem:[#allocation7 + $0x60] sm:$0xff]   ;;  %v2132_v12 = vld [vmem:[#allocation7 + $0x58] sm:$0xff]   ;;  %vm624_vm7 = vsmask.f32 256  ;;  %s1737_s23 = sshll.u32 %s2471_s26, 4 }
  0x4c   : > { %1884 = vmatprep.subr.bf16.mxu0 %v2123_v3  ;;  %1998 = vmatprep.subr.bf16.mxu1 %v2124_v4  ;;  %v2130_v10 = vld [vmem:[#allocation7 + $0xa0] sm:$0xff]   ;;  %v2133_v13 = vld [vmem:[#allocation7 + $0x98] sm:$0xff]   ;;  %v2135_v15 = vld [vmem:[#allocation7 + $0x50] sm:$0xff]   ;;  %vm632_vm9 = vsmask.f32 7938  ;;  %s204_s25 = scalar_lea.vmem [#allocation9], %s1737_s23 }
  0x4d   : > { %v2131_v11 = vld [vmem:[#allocation7 + $0x20] sm:$0xff]   ;;  %v2134_v14 = vld [vmem:[#allocation7 + $0x18] sm:$0xff]   ;;  %v2136_v16 = vld [vmem:[#allocation7 + $0x90] sm:$0xff]   ;;  %vm652_vm13 = vsmask.f32 4368  ;;  %s1645_s8 = sshll.u32 %s204_s25, 4  ;;  %s2626_s8 = int_to_ptr.vmem [resolvable:$true] %s1645_s8 }
  0x4e   : > { %v2137_v17 = vld [vmem:[#allocation7 + $0x10] sm:$0xff]   ;;  %v2138_v18 = vld [vmem:[#allocation7 + $0x48] sm:$0xff]   ;;  %v2141_v21 = vld [vmem:[#allocation7 + $0x40] sm:$0xff]   ;;  %s1870_s11 = sshll.u32 %s2370_s16, 8  ;;  %s1631_s22 = scalar_lea.sflag [#allocation6], %s2471_s26 }
  0x4f   : > { %1885 = vmatpush3.bf16.msra.mxu0 %v2125_v5  ;;  %1999 = vmatpush3.bf16.msra.mxu1 %v2124_v4  ;;  %v2139_v19 = vld [vmem:[#allocation7 + $0x88] sm:$0xff]   ;;  %v2142_v22 = vld [vmem:[#allocation7 + $0x80] sm:$0xff]   ;;  %v214_v25 = vld [vmem:[%s2475_s4 + $0x8] sm:$0x1]  ;;  %s2631_s17 = scalar_lea.hbm %s2677_s3, %s1870_s11  ;;  %s2252_s27 = scalar_lea.vmem %s2626_s8, 256 }
  0x50   : > { %1886 = vmatprep.subr.bf16.mxu0 %v2126_v6  ;;  %2000 = vmatprep.subr.bf16.mxu1 %v2127_v7  ;;  %v2140_v20 = vld [vmem:[#allocation7 + $0x8] sm:$0xff]   ;;  %vm2491_vm4 = vmor %vm277_vm2, %vm278_vm3  ;;  %v241_v32 = vshll.u32 %v214_v25, 16  ;;  %v285_v35 = vrot.slane %v214_v25, 5  ;;  %v2143_v40 = vld [vmem:[#allocation7] sm:$0xff]   ;;  %p2253_p3 = scmp.ne.s32.totalorder %s2626_s8, %s2252_s27  ;;  %p2705_p5 = scmp.ne.s32.totalorder %s2687_s6, 0 }
  0x51   : > { %v212_v23 = vld [vmem:[%s2475_s4] sm:$0xf]  ;;  %v213_v24 = vld [vmem:[%s2475_s4 + $0x4] sm:$0xf]  ;;  %v216_v44 = vld [vmem:[%s2475_s4 + $0x10] sm:$0xf] }
  0x52   : > { %v222_v26 = vshrl.u32 %v212_v23, 16  ;;  %v225_v27 = vshll.u32 %v212_v23, 16  ;;  %v231_v28 = vshll.u32 %v213_v24, 16  ;;  %v235_v29 = vshrl.u32 %v213_v24, 16  ;;  %v269_v30 = vld [vmem:[%s2475_s4] sm:$0xe]  ;;  %vm2502_vm5 = vmor %vm218_vm0, %vm219_vm1  ;;  %p2254_p7 = pnand %p2253_p3, %p2705_p5 }
  0x53   : > { %1887 = vmatpush3.bf16.msra.mxu0 %v2128_v8  ;;  %2001 = vmatpush3.bf16.msra.mxu1 %v2127_v7  ;;  %v1738_v33 = vrot.slane %v269_v30, 9  ;;  %v282_v34 = vrot.slane %v213_v24, 5  ;;  %v243_v41 = vrot.slane %v241_v32, 5  ;;  %v217_v47 = vld [vmem:[%s2475_s4 + $0x14] sm:$0x1]  ;;  %v289_v49 = vrot.slane %v216_v44, 5  ;;  %vm2524_vm8 = vmand %vm623_vm6, %vm624_vm7 }
  0x54   : > { %1888 = vmatprep.subr.bf16.mxu0 %v2129_v9  ;;  %2002 = vmatprep.subr.bf16.mxu1 %v2130_v10  ;;  %v224_v36 = vrot.slane %v222_v26, 4  ;;  %v227_v37 = vrot.slane %v225_v27, 5  ;;  %v233_v38 = vrot.slane %v231_v28, 5  ;;  %v237_v39 = vrot.slane %v235_v29, 4  ;;  %v270_v48 = vld [vmem:[%s2475_s4 + $0xc] sm:$0xe]  ;;  %vm2531_vm10 = vmand %vm623_vm6, %vm632_vm9  ;;  %p2255_p9 = pneg %p2254_p7 }
  0x55   : > { %v283_v42 = vsel %vm2491_vm4, %v1738_v33, %v282_v34  ;;  %v284_v43 = vrot.slane %v282_v34, 4  ;;  %v255_v50 = vshll.u32 %v216_v44, 16  ;;  %v1739_v53 = vrot.slane %v270_v48, 9  ;;  %v215_v55 = vld [vmem:[%s2475_s4 + $0xc] sm:$0xf]  ;;  %v2144_v3 = vld [vmem:[%s2475_s4] sm:$0xff]   ;;  %vm2549_vm12 = vmand %vm694_vm11, %vm632_vm9 }
  0x56   : > { %v228_v45 = vor.u32 %v227_v37, %v224_v36  ;;  %v238_v46 = vor.u32 %v237_v39, %v233_v38  ;;  %v292_v54 = vrot.slane %v217_v47, 5  ;;  %v259_v56 = vshrl.u32 %v216_v44, 16  ;;  %v637_v25 = vld [vmem:[#allocation2 + $0x14] sm:$0x1]  ;;  %v2146_v28 = vld [vmem:[#allocation7 + $0x138] sm:$0xff]   ;;  %v2152_v37 = vld [vmem:[#allocation7 + $0x128] sm:$0xff]  }
  0x57   : > { %1889 = vmatpush3.bf16.msra.mxu0 %v2131_v11  ;;  %2003 = vmatpush3.bf16.msra.mxu1 %v2130_v10  ;;  %v286_v52 = vsel %vm2491_vm4, %v284_v43, %v285_v35  ;;  %v291_v60 = vrot.slane %v289_v49, 4  ;;  %v290_v61 = vsel %vm2491_vm4, %v1739_v53, %v289_v49  ;;  %v246_v62 = vshrl.u32 %v215_v55, 16  ;;  %v2147_v29 = vld [vmem:[#allocation7 + $0xf8] sm:$0xff]   ;;  %v2149_v32 = vld [vmem:[#allocation7 + $0x130] sm:$0xff]   ;;  %v629_v34 = vld [vmem:[#allocation2 + $0xc] sm:$0x1] }
  0x58   : > { %1890 = vmatprep.subr.bf16.mxu0 %v2132_v12  ;;  %2004 = vmatprep.subr.bf16.mxu1 %v2133_v13  ;;  %v229_v57 = vrot.slane %v228_v45, 4  ;;  %v239_v58 = vrot.slane %v238_v46, 4  ;;  %v1744_v59 = vcombine.low %v283_v42, %v286_v52  ;;  %v249_v63 = vshll.u32 %v215_v55, 16  ;;  %v2148_v30 = vld [vmem:[#allocation7 + $0x178] sm:$0xff]   ;;  %v2150_v33 = vld [vmem:[#allocation7 + $0xf0] sm:$0xff]   ;;  %v2153_v42 = vld [vmem:[#allocation7 + $0xe8] sm:$0xff]  }
  0x59   : > { %v257_v0 = vrot.slane %v255_v50, 5  ;;  %v293_v4 = vsel %vm2491_vm4, %v291_v60, %v292_v54  ;;  %v261_v5 = vrot.slane %v259_v56, 4  ;;  %v248_v8 = vrot.slane %v246_v62, 4  ;;  %v2151_v36 = vld [vmem:[#allocation7 + $0x170] sm:$0xff]   ;;  %v1130_v39 = vld [vmem:[#allocation3 + $0x14] sm:$0x1]  ;;  %vm2556_vm14 = vmor %vm624_vm7, %vm652_vm13 }
  0x5a   : > { %v234_v1 = vsel %vm2502_vm5, %v229_v57, %v233_v38  ;;  %v244_v2 = vsel %vm2502_vm5, %v239_v58, %v243_v41  ;;  %2012 = vmatprep.mubr.bf16.mxu1 %v1744_v59  ;;  %v1745_v7 = vcombine.low %v290_v61, %v293_v4  ;;  %v251_v9 = vrot.slane %v249_v63, 5  ;;  %v1127_v38 = vld [vmem:[#allocation3 + $0x8] sm:$0x1]  ;;  %v2154_v43 = vld [vmem:[#allocation7 + $0x168] sm:$0xff]   ;;  %v2159_v48 = vld [vmem:[#allocation7 + $0xd8] sm:$0xff]   ;;  %s2326_s16 = smov [#allocation9]  }
  0x5b   : > { %1891 = vmatpush3.bf16.msra.mxu0 %v2134_v14  ;;  %2005 = vmatpush3.bf16.msra.mxu1 %v2133_v13  ;;  %v1742_v6 = vcombine.low %v234_v1, %v244_v2  ;;  %v262_v10 = vor.u32 %v261_v5, %v257_v0  ;;  %v265_v11 = vshll.u32 %v217_v47, 16  ;;  %v638_v27 = vsel %vm2531_vm10, 0, %v637_v25  ;;  %v2155_v44 = vld [vmem:[#allocation7 + $0x120] sm:$0xff]   ;;  %v2158_v47 = vld [vmem:[#allocation7 + $0x118] sm:$0xff]   ;;  %v2161_v50 = vld [vmem:[#allocation7 + $0x110] sm:$0xff]   ;;  %s2256_s30 = sshll.u32 %s2326_s16, 4  ;;  %s2257_s30 = int_to_ptr.vmem [resolvable:$false] %s2256_s30 }
  0x5c   : > { %1892 = vmatprep.subr.bf16.mxu0 %v2135_v15  ;;  %2006 = vmatprep.subr.bf16.mxu1 %v2136_v16  ;;  %v252_v12 = vor.u32 %v251_v9, %v248_v8  ;;  %639 = vst [vmem:[#allocation2 + $0x14] sm:$0x1] %v638_v27  ;;  %v630_v35 = vsel %vm2524_vm8, 0, %v629_v34  ;;  %v1131_v41 = vsel %vm2531_vm10, 0, %v1130_v39  ;;  %v2156_v45 = vld [vmem:[#allocation7 + $0xe0] sm:$0xff]   ;;  %v2160_v49 = vld [vmem:[#allocation7 + $0x158] sm:$0xff]   ;;  %p2259_p10 = scmp.lt.s32.totalorder %s2626_s8, %s2257_s30 }
  0x5d   : > { %553 = vmatprep.mubr.bf16.mxu0 %v1742_v6  ;;  %v263_v13 = vrot.slane %v262_v10, 4  ;;  %v267_v14 = vrot.slane %v265_v11, 5  ;;  %631 = vst [vmem:[#allocation2 + $0xc] sm:$0x1] %v630_v35  ;;  %1132 = vst [vmem:[#allocation3 + $0x14] sm:$0x1] %v1131_v41 }
  0x5e   : > { %v253_v15 = vrot.slane %v252_v12, 4  ;;  %v2157_v46 = vld [vmem:[#allocation7 + $0x160] sm:$0xff]   ;;  %v2162_v52 = vld [vmem:[#allocation7 + $0xd0] sm:$0xff]   ;;  %v2164_v54 = vld [vmem:[#allocation7 + $0x108] sm:$0xff]  }
  0x5f   : > { %1893 = vmatpush3.bf16.msra.mxu0 %v2137_v17  ;;  %2007 = vmatpush3.bf16.msra.mxu1 %v2136_v16  ;;  %v268_v16 = vsel %vm2502_vm5, %v263_v13, %v267_v14  ;;  %v2145_v17 = vld [vmem:[%s2475_s4 + $0xc] sm:$0xff]   ;;  %v2165_v55 = vld [vmem:[#allocation7 + $0xc8] sm:$0xff]   ;;  %s2258_s4 = scalar_lea.vmem %s2257_s30, 512 }
  0x60   : > { %1894 = vmatprep.subr.bf16.mxu0 %v2138_v18  ;;  %2008 = vmatprep.subr.bf16.mxu1 %v2139_v19  ;;  %v258_v18 = vsel %vm2502_vm5, %v253_v15, %v257_v0  ;;  %v2163_v53 = vld [vmem:[#allocation7 + $0x150] sm:$0xff]   ;;  %v2166_v56 = vld [vmem:[#allocation7 + $0x148] sm:$0xff]   ;;  %v2167_v57 = vld [vmem:[#allocation7 + $0x100] sm:$0xff]   ;;  %p2260_p12 = scmp.lt.s32.totalorder %s2258_s4, %s2252_s27 }
  0x61   : > { %v2168_v58 = vld [vmem:[#allocation7 + $0xc0] sm:$0xff]  }
  0x62   : > { %v2169_v59 = vld [vmem:[#allocation7 + $0x140] sm:$0xff]   ;;  %p2261_p13 = por %p2260_p12, %p2259_p10 }
  0x63   : > { %1895 = vmatpush3.bf16.msra.mxu0 %v2140_v20  ;;  %2009 = vmatpush3.bf16.msra.mxu1 %v2139_v19  ;;  %v1743_v19 = vcombine.low %v258_v18, %v268_v16  ;;  %v1746_v63 = vld [vmem:[%s2676_s2] ss:$0 sm:$0xff] }
  0x64   : > { %1896 = vmatprep.subr.bf16.mxu0 %v2141_v21  ;;  %2010 = vmatprep.subr.bf16.mxu1 %v2142_v22  ;;  %v626_v21 = vld [vmem:[#allocation2] sm:$0x1]  ;;  %p2262_p0 = pnand %p2261_p13, %p2255_p9 }
  0x65   : > { %v627_v23 = vsel %vm2524_vm8, 0, %v626_v21 }
  0x66   : > { %628 = vst [vmem:[#allocation2] sm:$0x1] %v627_v23 }
  0x67   : > { %1897 = vmatpush3.bf16.msra.mxu0 %v2143_v40  ;;  %2011 = vmatpush3.bf16.msra.mxu1 %v2142_v22  ;;  %v634_v22 = vld [vmem:[#allocation2 + $0x8] sm:$0x1]  ;;  %v1128_v40 = vsel %vm2531_vm10, 0, %v1127_v38 }
  0x68   : > { %v635_v26 = vsel %vm2531_vm10, 0, %v634_v22  ;;  %1920 = vmatprep.subr.bf16.mxu0 %v2146_v28  ;;  %2016 = vmatprep.subr.bf16.mxu1 %v2148_v30  ;;  %1129 = vst [vmem:[#allocation3 + $0x8] sm:$0x1] %v1128_v40 }
  0x69   : > { %636 = vst [vmem:[#allocation2 + $0x8] sm:$0x1] %v635_v26 }
  0x6a   : > { %2013 = vmatmul.mubr.bf16.vlgmr.msra.gmra.mxu1 %v1745_v7  ;;  %554 = vmatmul.mubr.bf16.vlgmr.msra.gmra.mxu0 %v2144_v3 }
  0x6b   : > { %561 = vmatprep.mubr.bf16.mxu0 %v1743_v19  ;;  %1921 = vmatpush3.bf16.msra.mxu0 %v2147_v29 }
  0x6c   : > { %1922 = vmatprep.subr.bf16.mxu0 %v2149_v32  ;;  %2017 = vmatpush3.bf16.msra.mxu1 %v2148_v30 }
  0x6d   : > { %2018 = vmatprep.subr.bf16.mxu1 %v2151_v36  ;;  %v696_v28 = vld [vmem:[#allocation2] sm:$0xf] }
  0x6f   : > { %1923 = vmatpush3.bf16.msra.mxu0 %v2150_v33 }
  0x70   : > { %1924 = vmatprep.subr.bf16.mxu0 %v2152_v37  ;;  %2019 = vmatpush3.bf16.msra.mxu1 %v2151_v36  ;;  %v700_v38 = vld [vmem:[#allocation2 + $0x8] sm:$0x1] }
  0x71   : > { %2020 = vmatprep.subr.bf16.mxu1 %v2154_v43 }
  0x72   : > { %562 = vmatmul.mubr.bf16.gmra.mxu0 %v2145_v17 }
  0x73   : > { %1925 = vmatpush3.bf16.msra.mxu0 %v2153_v42 }
  0x74   : > { %1926 = vmatprep.subr.bf16.mxu0 %v2155_v44  ;;  %2021 = vmatpush3.bf16.msra.mxu1 %v2154_v43 }
  0x75   : > { %2022 = vmatprep.subr.bf16.mxu1 %v2157_v46 }
  0x77   : > { %1927 = vmatpush3.bf16.msra.mxu0 %v2156_v45 }
  0x78   : > { %1928 = vmatprep.subr.bf16.mxu0 %v2158_v47  ;;  %2023 = vmatpush3.bf16.msra.mxu1 %v2157_v46 }
  0x79   : > { %2024 = vmatprep.subr.bf16.mxu1 %v2160_v49 }
  0x7b   : > { %1929 = vmatpush3.bf16.msra.mxu0 %v2159_v48 }
  0x7c   : > { %1930 = vmatprep.subr.bf16.mxu0 %v2161_v50  ;;  %2025 = vmatpush3.bf16.msra.mxu1 %v2160_v49 }
  0x7d   : > { %2026 = vmatprep.subr.bf16.mxu1 %v2163_v53 }
  0x7f   : > { %1931 = vmatpush3.bf16.msra.mxu0 %v2162_v52  ;;  %v703_v52 = vld [vmem:[#allocation2 + $0xc] sm:$0xf] }
  0x80   : > { %1932 = vmatprep.subr.bf16.mxu0 %v2164_v54  ;;  %2027 = vmatpush3.bf16.msra.mxu1 %v2163_v53 }
  0x81   : > { %2028 = vmatprep.subr.bf16.mxu1 %v2166_v56 }
  0x83   : > { %1933 = vmatpush3.bf16.msra.mxu0 %v2165_v55 }
  0x84   : > { %1934 = vmatprep.subr.bf16.mxu0 %v2167_v57  ;;  %2029 = vmatpush3.bf16.msra.mxu1 %v2166_v56 }
  0x85   : > { %2030 = vmatprep.subr.bf16.mxu1 %v2169_v59 }
  0x87   : > { %1935 = vmatpush3.bf16.msra.mxu0 %v2168_v58 }
  0x88   : > { %2031 = vmatpush3.bf16.msra.mxu1 %v2169_v59 }
 0x12a   : > { %v2014_v60 = vpop.f32.mrf.mxu1  ;;  %v1898_v61 = vpop.f32.mrf.mxu0 }
 0x12c   : > { %v1899_v62 = vpop.f32.mrf.mxu0  ;;  %v604_v0 = vpop.f32.mrf.mxu1 }
 0x12d   : > { %v1900_v1 = vadd.f32 %v1899_v62, %v1898_v61 }
 0x12e   : > { %v1901_v2 = vpop.f32.mrf.mxu0  ;;  %v2015_v4 = vpop.f32.mrf.mxu1 }
 0x12f   : > { %v556_v3 = vadd.f32 %v1900_v1, %v1746_v63 }
 0x130   : > { %v1902_v5 = vpop.f32.mrf.mxu0  ;;  %v607_v11 = vpop.f32.mrf.mxu1 }
 0x131   : > { %v605_v6 = vadd.f32 %v604_v0, %v556_v3  ;;  %v1903_v7 = vadd.f32 %v1902_v5, %v1901_v2 }
 0x132   : > { %v1904_v8 = vpop.f32.mrf.mxu0 }
 0x133   : > { %v619_v9 = vmax.f32 %v605_v6, 0.0  ;;  %v559_v10 = vadd.f32 %v1903_v7, %v1746_v63 }
 0x134   : > { %v1905_v12 = vpop.f32.mrf.mxu0 }
 0x135   : > { %v1857_v13 = vpack.c.bf16 %v619_v9, %v619_v9  ;;  %v608_v14 = vadd.f32 %v607_v11, %v559_v10  ;;  %v1906_v15 = vadd.f32 %v1905_v12, %v1904_v8 }
 0x136   : > { %v1907_v16 = vpop.f32.mrf.mxu0 }
 0x137   : > { %v655_v17 = vshrl.u32 %v1857_v13, 16  ;;  %v620_v18 = vmax.f32 %v608_v14, 0.0  ;;  %v564_v19 = vadd.f32 %v1906_v15, %v1746_v63  ;;  %v658_v21 = vshll.u32 %v1857_v13, 16 }
 0x138   : > { %v1908_v22 = vpop.f32.mrf.mxu0 }
 0x139   : > { %v657_v23 = vrot.slane %v655_v17, 7  ;;  %v1858_v24 = vpack.c.bf16 %v620_v18, %v620_v18  ;;  %v613_v25 = vadd.f32 %v2014_v60, %v564_v19  ;;  %v1909_v26 = vadd.f32 %v1908_v22, %v1907_v16  ;;  %v707_v60 = vld [vmem:[#allocation2 + $0x14] sm:$0x1] }
 0x13b   : > { %v660_v29 = vor.u32 %v658_v21, %v657_v23  ;;  %v663_v30 = vshrl.u32 %v1858_v24, 16  ;;  %v621_v32 = vmax.f32 %v613_v25, 0.0  ;;  %v567_v33 = vadd.f32 %v1909_v26, %v1746_v63 }
 0x13c   : > { %v666_v36 = vshll.u32 %v1858_v24, 16  ;;  %v661_v41 = vrot.slane %v657_v23, 4 }
 0x13d   : > { %v697_v34 = vsel %vm2549_vm12, %v660_v29, %v696_v28  ;;  %v665_v35 = vrot.slane %v663_v30, 7  ;;  %v1859_v39 = vpack.c.bf16 %v621_v32, %v621_v32  ;;  %v616_v40 = vadd.f32 %v2015_v4, %v567_v33 }
 0x13e   : > { %698 = vst [vmem:[#allocation2] sm:$0xf] %v697_v34 }
 0x13f   : > { %v668_v42 = vor.u32 %v666_v36, %v665_v35  ;;  %v670_v43 = vrot.slane %v665_v35, 4  ;;  %v672_v44 = vshrl.u32 %v1859_v39, 16  ;;  %v622_v45 = vmax.f32 %v616_v40, 0.0 }
 0x140   : > { %v675_v49 = vshll.u32 %v1859_v39, 16 }
 0x141   : > { %v669_v46 = vsel %vm2556_vm14, %v661_v41, %v668_v42  ;;  %v701_v47 = vsel %vm2524_vm8, %v670_v43, %v700_v38  ;;  %v674_v48 = vrot.slane %v672_v44, 7  ;;  %v1860_v50 = vpack.c.bf16 %v622_v45, %v622_v45 }
 0x142   : > { %699 = vst [vmem:[#allocation2 + $0x4] sm:$0xf] %v669_v46  ;;  %702 = vst [vmem:[#allocation2 + $0x8] sm:$0x1] %v701_v47 }
 0x143   : > { %v677_v53 = vor.u32 %v675_v49, %v674_v48  ;;  %v680_v54 = vshrl.u32 %v1860_v50, 16  ;;  %v683_v58 = vshll.u32 %v1860_v50, 16  ;;  %v678_v62 = vrot.slane %v674_v48, 4 }
 0x145   : > { %v714_v55 = vld [vmem:[#allocation2] sm:$0xf]  ;;  %v704_v56 = vsel %vm2549_vm12, %v677_v53, %v703_v52  ;;  %v682_v57 = vrot.slane %v680_v54, 7 }
 0x146   : > { %v721_v59 = vshrl.u32 %v714_v55, 16  ;;  %705 = vst [vmem:[#allocation2 + $0xc] sm:$0xf] %v704_v56  ;;  %v724_v61 = vshll.u32 %v714_v55, 16  ;;  %v768_v1 = vld [vmem:[#allocation2] sm:$0xe] }
 0x147   : > { %v685_v63 = vor.u32 %v683_v58, %v682_v57  ;;  %v687_v0 = vrot.slane %v682_v57, 4  ;;  %v1775_v12 = vrot.slane %v768_v1, 9  ;;  %v2172_v1 = vld [vmem:[#allocation7 + $0x1f8] sm:$0xff]  }
 0x148   : > { %v723_v2 = vrot.slane %v721_v59, 4  ;;  %v726_v5 = vrot.slane %v724_v61, 5  ;;  %1958 = vmatprep.subr.bf16.mxu0 %v2172_v1 }
 0x149   : > { %v715_v3 = vld [vmem:[#allocation2 + $0x4] sm:$0xf]  ;;  %v716_v4 = vld [vmem:[#allocation2 + $0x8] sm:$0x1]  ;;  %v686_v6 = vsel %vm2556_vm14, %v678_v62, %v685_v63  ;;  %v708_v7 = vsel %vm2524_vm8, %v687_v0, %v707_v60  ;;  %v1121_v63 = vld [vmem:[#allocation3] sm:$0x1] }
 0x14a   : > { %v778_v8 = vrot.slane %v715_v3, 5  ;;  %706 = vst [vmem:[#allocation2 + $0x10] sm:$0xf] %v686_v6  ;;  %709 = vst [vmem:[#allocation2 + $0x14] sm:$0x1] %v708_v7  ;;  %v727_v9 = vor.u32 %v726_v5, %v723_v2  ;;  %v730_v10 = vshll.u32 %v715_v3, 16 }
 0x14b   : > { %v734_v11 = vshrl.u32 %v715_v3, 16  ;;  %v781_v14 = vrot.slane %v716_v4, 5  ;;  %v740_v17 = vshll.u32 %v716_v4, 16  ;;  %v2170_v44 = vld [vmem:[#allocation2] sm:$0xff]   ;;  %v1122_v0 = vsel %vm2524_vm8, 0, %v1121_v63  ;;  %v2173_v2 = vld [vmem:[#allocation7 + $0x1b8] sm:$0xff]  }
 0x14c   : > { %v780_v13 = vrot.slane %v778_v8, 4  ;;  %v732_v15 = vrot.slane %v730_v10, 5  ;;  %v779_v18 = vsel %vm2491_vm4, %v1775_v12, %v778_v8  ;;  %v728_v23 = vrot.slane %v727_v9, 4  ;;  %1123 = vst [vmem:[#allocation3] sm:$0x1] %v1122_v0  ;;  %v2174_v3 = vld [vmem:[#allocation7 + $0x238] sm:$0xff]  }
 0x14d   : > { %v736_v16 = vrot.slane %v734_v11, 4  ;;  %v717_v21 = vld [vmem:[#allocation2 + $0xc] sm:$0xf]  ;;  %v742_v29 = vrot.slane %v740_v17, 5  ;;  %v2175_v4 = vld [vmem:[#allocation7 + $0x1f0] sm:$0xff]   ;;  %2036 = vmatprep.subr.bf16.mxu1 %v2174_v3  ;;  %v2181_v12 = vld [vmem:[#allocation7 + $0x1e0] sm:$0xff]  }
 0x14e   : > { %v782_v19 = vsel %vm2491_vm4, %v780_v13, %v781_v14  ;;  %v745_v25 = vshrl.u32 %v717_v21, 16  ;;  %v748_v26 = vshll.u32 %v717_v21, 16  ;;  %v769_v30 = vld [vmem:[#allocation2 + $0xc] sm:$0xe]  ;;  %v733_v36 = vsel %vm2502_vm5, %v728_v23, %v732_v15  ;;  %v2176_v5 = vld [vmem:[#allocation7 + $0x1b0] sm:$0xff]   ;;  %v2182_v13 = vld [vmem:[#allocation7 + $0x1a0] sm:$0xff]  }
 0x14f   : > { %v1781_v22 = vcombine.low %v779_v18, %v782_v19  ;;  %v737_v24 = vor.u32 %v736_v16, %v732_v15  ;;  %v1776_v45 = vrot.slane %v769_v30, 9  ;;  %v1124_v6 = vld [vmem:[#allocation3 + $0xc] sm:$0x1]  ;;  %v2177_v7 = vld [vmem:[#allocation7 + $0x230] sm:$0xff]   ;;  %v2178_v9 = vld [vmem:[#allocation7 + $0x1e8] sm:$0xff]  }
 0x150   : > { %v747_v34 = vrot.slane %v745_v25, 4  ;;  %v750_v35 = vrot.slane %v748_v26, 5  ;;  %v1125_v8 = vsel %vm2524_vm8, 0, %v1124_v6  ;;  %v2179_v10 = vld [vmem:[#allocation7 + $0x1a8] sm:$0xff]   ;;  %v2183_v14 = vld [vmem:[#allocation7 + $0x220] sm:$0xff]   ;;  %v2184_v15 = vld [vmem:[#allocation7 + $0x1d8] sm:$0xff]  }
 0x151   : > { %2032 = vmatprep.mubr.bf16.mxu1 %v1781_v22  ;;  %v738_v28 = vrot.slane %v737_v24, 4  ;;  %v718_v32 = vld [vmem:[#allocation2 + $0x10] sm:$0xf]  ;;  %v719_v33 = vld [vmem:[#allocation2 + $0x14] sm:$0x1]  ;;  %v2180_v11 = vld [vmem:[#allocation7 + $0x228] sm:$0xff]  }
 0x152   : > { %v785_v39 = vrot.slane %v718_v32, 5  ;;  %v754_v40 = vshll.u32 %v718_v32, 16  ;;  %v751_v42 = vor.u32 %v750_v35, %v747_v34  ;;  %v758_v43 = vshrl.u32 %v718_v32, 16  ;;  %v2171_v62 = vld [vmem:[#allocation2 + $0xc] sm:$0xff]   ;;  %1126 = vst [vmem:[#allocation3 + $0xc] sm:$0x1] %v1125_v8 }
 0x153   : > { %v743_v38 = vsel %vm2502_vm5, %v738_v28, %v742_v29  ;;  %v788_v47 = vrot.slane %v719_v33, 5  ;;  %v764_v50 = vshll.u32 %v719_v33, 16  ;;  %v2185_v16 = vld [vmem:[#allocation7 + $0x198] sm:$0xff]   ;;  %v2187_v18 = vld [vmem:[#allocation7 + $0x1d0] sm:$0xff]   ;;  %v2190_v22 = vld [vmem:[#allocation7 + $0x1c8] sm:$0xff]  }
 0x154   : > { %v1779_v41 = vcombine.low %v733_v36, %v743_v38  ;;  %v787_v46 = vrot.slane %v785_v39, 4  ;;  %v756_v48 = vrot.slane %v754_v40, 5  ;;  %v760_v49 = vrot.slane %v758_v43, 4  ;;  %v2186_v17 = vld [vmem:[#allocation7 + $0x218] sm:$0xff]   ;;  %v2188_v19 = vld [vmem:[#allocation7 + $0x190] sm:$0xff]   ;;  %v2191_v23 = vld [vmem:[#allocation7 + $0x188] sm:$0xff]  }
 0x155   : > { %v786_v52 = vsel %vm2491_vm4, %v1776_v45, %v785_v39  ;;  %v752_v55 = vrot.slane %v751_v42, 4  ;;  %v766_v58 = vrot.slane %v764_v50, 5  ;;  %v2189_v21 = vld [vmem:[#allocation7 + $0x210] sm:$0xff]   ;;  %v2192_v24 = vld [vmem:[#allocation7 + $0x208] sm:$0xff]   ;;  %v2193_v25 = vld [vmem:[#allocation7 + $0x1c0] sm:$0xff]  }
 0x156   : > { %1051 = vmatprep.mubr.bf16.mxu0 %v1779_v41  ;;  %v789_v53 = vsel %vm2491_vm4, %v787_v46, %v788_v47  ;;  %v761_v56 = vor.u32 %v760_v49, %v756_v48  ;;  %v2194_v26 = vld [vmem:[#allocation7 + $0x180] sm:$0xff]  }
 0x157   : > { %1052 = vmatmul.mubr.bf16.vlgmr.msra.gmra.mxu0 %v2170_v44  ;;  %v1782_v54 = vcombine.low %v786_v52, %v789_v53  ;;  %v757_v59 = vsel %vm2502_vm5, %v752_v55, %v756_v48  ;;  %v2195_v28 = vld [vmem:[#allocation7 + $0x200] sm:$0xff]  }
 0x158   : > { %v762_v57 = vrot.slane %v761_v56, 4  ;;  %1959 = vmatpush3.bf16.msra.mxu0 %v2173_v2  ;;  %v1784_v32 = vld [vmem:[%s2676_s2 + $0x1] ss:$0 sm:$0xff]  ;;  %v1189_v6 = vld [vmem:[#allocation3 + $0x8] sm:$0x1] }
 0x159   : > { %2033 = vmatmul.mubr.bf16.vlgmr.msra.gmra.mxu1 %v1782_v54  ;;  %1960 = vmatprep.subr.bf16.mxu0 %v2175_v4 }
 0x15a   : > { %v767_v60 = vsel %vm2502_vm5, %v762_v57, %v766_v58  ;;  %2037 = vmatpush3.bf16.msra.mxu1 %v2174_v3 }
 0x15b   : > { %v1780_v61 = vcombine.low %v757_v59, %v767_v60  ;;  %2038 = vmatprep.subr.bf16.mxu1 %v2177_v7  ;;  %v1185_v60 = vld [vmem:[#allocation3] sm:$0xf] }
 0x15c   : > { %1961 = vmatpush3.bf16.msra.mxu0 %v2176_v5 }
 0x15d   : > { %1059 = vmatprep.mubr.bf16.mxu0 %v1780_v61  ;;  %1962 = vmatprep.subr.bf16.mxu0 %v2178_v9 }
 0x15e   : > { %2039 = vmatpush3.bf16.msra.mxu1 %v2177_v7 }
 0x15f   : > { %1060 = vmatmul.mubr.bf16.gmra.mxu0 %v2171_v62  ;;  %2040 = vmatprep.subr.bf16.mxu1 %v2180_v11 }
 0x160   : > { %1963 = vmatpush3.bf16.msra.mxu0 %v2179_v10 }
 0x161   : > { %1964 = vmatprep.subr.bf16.mxu0 %v2181_v12 }
 0x162   : > { %2041 = vmatpush3.bf16.msra.mxu1 %v2180_v11 }
 0x163   : > { %2042 = vmatprep.subr.bf16.mxu1 %v2183_v14 }
 0x164   : > { %1965 = vmatpush3.bf16.msra.mxu0 %v2182_v13 }
 0x165   : > { %1966 = vmatprep.subr.bf16.mxu0 %v2184_v15 }
 0x166   : > { %2043 = vmatpush3.bf16.msra.mxu1 %v2183_v14 }
 0x167   : > { %2044 = vmatprep.subr.bf16.mxu1 %v2186_v17 }
 0x168   : > { %1967 = vmatpush3.bf16.msra.mxu0 %v2185_v16 }
 0x169   : > { %1968 = vmatprep.subr.bf16.mxu0 %v2187_v18 }
 0x16a   : > { %2045 = vmatpush3.bf16.msra.mxu1 %v2186_v17 }
 0x16b   : > { %2046 = vmatprep.subr.bf16.mxu1 %v2189_v21 }
 0x16c   : > { %1969 = vmatpush3.bf16.msra.mxu0 %v2188_v19  ;;  %v1192_v19 = vld [vmem:[#allocation3 + $0xc] sm:$0xf] }
 0x16d   : > { %1970 = vmatprep.subr.bf16.mxu0 %v2190_v22 }
 0x16e   : > { %2047 = vmatpush3.bf16.msra.mxu1 %v2189_v21 }
 0x16f   : > { %2048 = vmatprep.subr.bf16.mxu1 %v2192_v24 }
 0x170   : > { %1971 = vmatpush3.bf16.msra.mxu0 %v2191_v23 }
 0x171   : > { %1972 = vmatprep.subr.bf16.mxu0 %v2193_v25 }
 0x172   : > { %2049 = vmatpush3.bf16.msra.mxu1 %v2192_v24 }
 0x173   : > { %2050 = vmatprep.subr.bf16.mxu1 %v2195_v28 }
 0x174   : > { %1973 = vmatpush3.bf16.msra.mxu0 %v2194_v26 }
 0x176   : > { %2051 = vmatpush3.bf16.msra.mxu1 %v2195_v28 }
 0x217   : > { %v1936_v29 = vpop.f32.mrf.mxu0 }
 0x219   : > { %v1937_v30 = vpop.f32.mrf.mxu0  ;;  %v2034_v34 = vpop.f32.mrf.mxu1 }
 0x21a   : > { %v1938_v33 = vadd.f32 %v1937_v30, %v1936_v29  ;;  %v1196_v29 = vld [vmem:[#allocation3 + $0x14] sm:$0x1] }
 0x21b   : > { %v1939_v35 = vpop.f32.mrf.mxu0  ;;  %v1102_v38 = vpop.f32.mrf.mxu1 }
 0x21c   : > { %v1054_v36 = vadd.f32 %v1938_v33, %v1784_v32 }
 0x21d   : > { %v1940_v39 = vpop.f32.mrf.mxu0  ;;  %v2035_v42 = vpop.f32.mrf.mxu1 }
 0x21e   : > { %v1103_v40 = vadd.f32 %v1102_v38, %v1054_v36  ;;  %v1941_v41 = vadd.f32 %v1940_v39, %v1939_v35 }
 0x21f   : > { %v1942_v44 = vpop.f32.mrf.mxu0  ;;  %v1105_v46 = vpop.f32.mrf.mxu1 }
 0x220   : > { %v1117_v43 = vmax.f32 %v1103_v40, 0.0  ;;  %v1057_v45 = vadd.f32 %v1941_v41, %v1784_v32 }
 0x221   : > { %v1943_v49 = vpop.f32.mrf.mxu0 }
 0x222   : > { %v1861_v47 = vpack.c.bf16 %v1117_v43, %v1117_v43  ;;  %v1106_v48 = vadd.f32 %v1105_v46, %v1057_v45  ;;  %v1944_v50 = vadd.f32 %v1943_v49, %v1942_v44 }
 0x223   : > { %v1945_v54 = vpop.f32.mrf.mxu0 }
 0x224   : > { %v1146_v52 = vshrl.u32 %v1861_v47, 16  ;;  %v1118_v53 = vmax.f32 %v1106_v48, 0.0  ;;  %v1062_v55 = vadd.f32 %v1944_v50, %v1784_v32  ;;  %v1149_v57 = vshll.u32 %v1861_v47, 16 }
 0x225   : > { %v1946_v59 = vpop.f32.mrf.mxu0 }
 0x226   : > { %v1148_v56 = vrot.slane %v1146_v52, 7  ;;  %v1862_v58 = vpack.c.bf16 %v1118_v53, %v1118_v53  ;;  %v1111_v61 = vadd.f32 %v2034_v34, %v1062_v55  ;;  %v1947_v62 = vadd.f32 %v1946_v59, %v1945_v54 }
 0x228   : > { %v1151_v63 = vor.u32 %v1149_v57, %v1148_v56  ;;  %v1154_v0 = vshrl.u32 %v1862_v58, 16  ;;  %v1119_v1 = vmax.f32 %v1111_v61, 0.0  ;;  %v1065_v2 = vadd.f32 %v1947_v62, %v1784_v32 }
 0x229   : > { %v1157_v5 = vshll.u32 %v1862_v58, 16  ;;  %v1152_v9 = vrot.slane %v1148_v56, 4 }
 0x22a   : > { %v1186_v3 = vsel %vm2549_vm12, %v1151_v63, %v1185_v60  ;;  %v1156_v4 = vrot.slane %v1154_v0, 7  ;;  %v1863_v7 = vpack.c.bf16 %v1119_v1, %v1119_v1  ;;  %v1114_v8 = vadd.f32 %v2035_v42, %v1065_v2 }
 0x22b   : > { %1187 = vst [vmem:[#allocation3] sm:$0xf] %v1186_v3 }
 0x22c   : > { %v1159_v10 = vor.u32 %v1157_v5, %v1156_v4  ;;  %v1161_v11 = vrot.slane %v1156_v4, 4  ;;  %v1163_v12 = vshrl.u32 %v1863_v7, 16  ;;  %v1120_v13 = vmax.f32 %v1114_v8, 0.0 }
 0x22d   : > { %v1166_v17 = vshll.u32 %v1863_v7, 16 }
 0x22e   : > { %v1160_v14 = vsel %vm2556_vm14, %v1152_v9, %v1159_v10  ;;  %v1190_v15 = vsel %vm2524_vm8, %v1161_v11, %v1189_v6  ;;  %v1165_v16 = vrot.slane %v1163_v12, 7  ;;  %v1864_v18 = vpack.c.bf16 %v1120_v13, %v1120_v13 }
 0x22f   : > { %1188 = vst [vmem:[#allocation3 + $0x4] sm:$0xf] %v1160_v14  ;;  %1191 = vst [vmem:[#allocation3 + $0x8] sm:$0x1] %v1190_v15 }
 0x230   : > { %v1168_v21 = vor.u32 %v1166_v17, %v1165_v16  ;;  %v1171_v22 = vshrl.u32 %v1864_v18, 16  ;;  %v1174_v26 = vshll.u32 %v1864_v18, 16  ;;  %v1169_v32 = vrot.slane %v1165_v16, 4 }
 0x232   : > { %v1203_v23 = vld [vmem:[#allocation3] sm:$0xf]  ;;  %v1193_v24 = vsel %vm2549_vm12, %v1168_v21, %v1192_v19  ;;  %v1173_v25 = vrot.slane %v1171_v22, 7 }
 0x233   : > { %v1210_v28 = vshrl.u32 %v1203_v23, 16  ;;  %1194 = vst [vmem:[#allocation3 + $0xc] sm:$0xf] %v1193_v24  ;;  %v1213_v30 = vshll.u32 %v1203_v23, 16  ;;  %v1257_v35 = vld [vmem:[#allocation3] sm:$0xe] }
 0x234   : > { %v1176_v33 = vor.u32 %v1174_v26, %v1173_v25  ;;  %v1178_v34 = vrot.slane %v1173_v25, 4  ;;  %v1813_v46 = vrot.slane %v1257_v35, 9 }
 0x235   : > { %v1212_v36 = vrot.slane %v1210_v28, 4  ;;  %v1215_v40 = vrot.slane %v1213_v30, 5  ;;  %v1822_v30 = vld [vmem:[%s2676_s2 + $0x2] ss:$0 sm:$0xff] }
 0x236   : > { %v1204_v38 = vld [vmem:[#allocation3 + $0x4] sm:$0xf]  ;;  %v1205_v39 = vld [vmem:[#allocation3 + $0x8] sm:$0x1]  ;;  %v1177_v41 = vsel %vm2556_vm14, %v1169_v32, %v1176_v33  ;;  %v1197_v27 = vsel %vm2524_vm8, %v1178_v34, %v1196_v29 }
 0x237   : > { %v1267_v42 = vrot.slane %v1204_v38, 5  ;;  %1195 = vst [vmem:[#allocation3 + $0x10] sm:$0xf] %v1177_v41  ;;  %1198 = vst [vmem:[#allocation3 + $0x14] sm:$0x1] %v1197_v27  ;;  %v1216_v43 = vor.u32 %v1215_v40, %v1212_v36  ;;  %v1219_v44 = vshll.u32 %v1204_v38, 16 }
 0x238   : > { %v1223_v45 = vshrl.u32 %v1204_v38, 16  ;;  %v1270_v48 = vrot.slane %v1205_v39, 5  ;;  %v1229_v52 = vshll.u32 %v1205_v39, 16  ;;  %v2196_v9 = vld [vmem:[#allocation3] sm:$0xff]  }
 0x239   : > { %v1269_v47 = vrot.slane %v1267_v42, 4  ;;  %v1221_v49 = vrot.slane %v1219_v44, 5  ;;  %v1268_v53 = vsel %vm2491_vm4, %v1813_v46, %v1267_v42  ;;  %v1217_v55 = vrot.slane %v1216_v43, 4 }
 0x23a   : > { %v1225_v50 = vrot.slane %v1223_v45, 4  ;;  %v1206_v20 = vld [vmem:[#allocation3 + $0xc] sm:$0xf]  ;;  %v1231_v60 = vrot.slane %v1229_v52, 5 }
 0x23b   : > { %v1271_v37 = vsel %vm2491_vm4, %v1269_v47, %v1270_v48  ;;  %v1234_v57 = vshrl.u32 %v1206_v20, 16  ;;  %v1237_v58 = vshll.u32 %v1206_v20, 16  ;;  %v1258_v61 = vld [vmem:[#allocation3 + $0xc] sm:$0xe]  ;;  %v1222_v2 = vsel %vm2502_vm5, %v1217_v55, %v1221_v49 }
 0x23c   : > { %v1819_v54 = vcombine.low %v1268_v53, %v1271_v37  ;;  %v1226_v56 = vor.u32 %v1225_v50, %v1221_v49  ;;  %v1814_v10 = vrot.slane %v1258_v61, 9 }
 0x23d   : > { %v1236_v0 = vrot.slane %v1234_v57, 4  ;;  %v1239_v1 = vrot.slane %v1237_v58, 5 }
 0x23e   : > { %2052 = vmatprep.mubr.bf16.mxu1 %v1819_v54  ;;  %v1227_v59 = vrot.slane %v1226_v56, 4  ;;  %v1207_v62 = vld [vmem:[#allocation3 + $0x10] sm:$0xf]  ;;  %v1208_v63 = vld [vmem:[#allocation3 + $0x14] sm:$0x1] }
 0x23f   : > { %v1274_v4 = vrot.slane %v1207_v62, 5  ;;  %v1243_v5 = vshll.u32 %v1207_v62, 16  ;;  %v1240_v7 = vor.u32 %v1239_v1, %v1236_v0  ;;  %v1247_v8 = vshrl.u32 %v1207_v62, 16  ;;  %v2197_v28 = vld [vmem:[#allocation3 + $0xc] sm:$0xff]  }
 0x240   : > { %v1232_v3 = vsel %vm2502_vm5, %v1227_v59, %v1231_v60  ;;  %v1277_v12 = vrot.slane %v1208_v63, 5  ;;  %v1253_v15 = vshll.u32 %v1208_v63, 16 }
 0x241   : > { %v1817_v6 = vcombine.low %v1222_v2, %v1232_v3  ;;  %v1276_v11 = vrot.slane %v1274_v4, 4  ;;  %v1245_v13 = vrot.slane %v1243_v5, 5  ;;  %v1249_v14 = vrot.slane %v1247_v8, 4 }
 0x242   : > { %v1275_v16 = vsel %vm2491_vm4, %v1814_v10, %v1274_v4  ;;  %v1241_v19 = vrot.slane %v1240_v7, 4  ;;  %v1255_v23 = vrot.slane %v1253_v15, 5 }
 0x243   : > { %1540 = vmatprep.mubr.bf16.mxu0 %v1817_v6  ;;  %v1278_v17 = vsel %vm2491_vm4, %v1276_v11, %v1277_v12  ;;  %v1250_v21 = vor.u32 %v1249_v14, %v1245_v13 }
 0x244   : > { %1541 = vmatmul.mubr.bf16.vlgmr.msra.gmra.mxu0 %v2196_v9  ;;  %v1820_v18 = vcombine.low %v1275_v16, %v1278_v17  ;;  %v1246_v24 = vsel %vm2502_vm5, %v1241_v19, %v1245_v13 }
 0x245   : > { %v1251_v22 = vrot.slane %v1250_v21, 4 }
 0x246   : > { %2053 = vmatmul.mubr.bf16.vlgmr.msra.gmra.mxu1 %v1820_v18 }
 0x247   : > { %v1256_v25 = vsel %vm2502_vm5, %v1251_v22, %v1255_v23 }
 0x248   : > { %v1818_v26 = vcombine.low %v1246_v24, %v1256_v25 }
 0x24a   : > { %1548 = vmatprep.mubr.bf16.mxu0 %v1818_v26 }
 0x24c   : > { %1549 = vmatmul.mubr.bf16.gmra.mxu0 %v2197_v28 }
 0x304   : > { %v1974_v29 = vpop.f32.mrf.mxu0 }
 0x306   : > { %v1975_v31 = vpop.f32.mrf.mxu0  ;;  %v2054_v33 = vpop.f32.mrf.mxu1 }
 0x307   : > { %v1976_v32 = vadd.f32 %v1975_v31, %v1974_v29 }
 0x308   : > { %v1977_v34 = vpop.f32.mrf.mxu0  ;;  %v1591_v36 = vpop.f32.mrf.mxu1 }
 0x309   : > { %v1543_v35 = vadd.f32 %v1976_v32, %v1822_v30 }
 0x30a   : > { %v1978_v38 = vpop.f32.mrf.mxu0  ;;  %v2055_v51 = vpop.f32.mrf.mxu1 }
 0x30b   : > { %v1979_v39 = vadd.f32 %v1978_v38, %v1977_v34  ;;  %v1592_v40 = vadd.f32 %v1591_v36, %v1543_v35 }
 0x30c   : > { %v1980_v41 = vpop.f32.mrf.mxu0  ;;  %v1594_v42 = vpop.f32.mrf.mxu1 }
 0x30d   : > { %v1546_v27 = vadd.f32 %v1979_v39, %v1822_v30  ;;  %v1606_v46 = vmax.f32 %v1592_v40, 0.0 }
 0x30e   : > { %v1981_v44 = vpop.f32.mrf.mxu0 }
 0x30f   : > { %v1595_v43 = vadd.f32 %v1594_v42, %v1546_v27  ;;  %v1982_v45 = vadd.f32 %v1981_v44, %v1980_v41 }
 0x310   : > { %v1983_v48 = vpop.f32.mrf.mxu0 }
 0x311   : > { %v1607_v47 = vmax.f32 %v1595_v43, 0.0  ;;  %v1551_v49 = vadd.f32 %v1982_v45, %v1822_v30 }
 0x312   : > { %v1984_v52 = vpop.f32.mrf.mxu0 }
 0x313   : > { %v1874_v50 = vpack.c.bf16 %v1607_v47, %v1606_v46  ;;  %v1985_v53 = vadd.f32 %v1984_v52, %v1983_v48  ;;  %v1600_v37 = vadd.f32 %v2054_v33, %v1551_v49 }
 0x315   : > { %1875 = vst [vmem:[%s204_s25] sm:$0xff] %v1874_v50   ;;  %v1554_v20 = vadd.f32 %v1985_v53, %v1822_v30  ;;  %v1608_v55 = vmax.f32 %v1600_v37, 0.0 }
 0x317   : > { %v1603_v54 = vadd.f32 %v2055_v51, %v1554_v20 }
 0x319   : > { %v1609_v56 = vmax.f32 %v1603_v54, 0.0 }
 0x31b   : > { %v1879_v57 = vpack.c.bf16 %v1609_v56, %v1608_v55 }
 0x31d   : > { %1881 = vst [vmem:[%s204_s25 + $0x8] sm:$0xff] %v1879_v57  }
 0x31e   : > { %2265 = shalt.err (!%p2262_p0)
}
 0x31f   : > { %s2266_s18 = scalar_lea.hbm %s2631_s17, 256  ;;  %s2270_s29 = scalar_lea.hbm %s2677_s3, 512 }
 0x320   : > { %p2267_p11 = scmp.ne.s32.totalorder %s2631_s17, %s2266_s18  ;;  %p2271_p4 = scmp.lt.s32.totalorder %s2631_s17, %s2677_s3 }
 0x321   : > { %p2272_p6 = scmp.lt.s32.totalorder %s2270_s29, %s2266_s18 }
 0x322   : > { %p2268_p2 = pnand %p2267_p11, %p2705_p5 }
 0x323   : > { %p2273_p8 = por %p2272_p6, %p2271_p4 }
 0x324   : > { %p2269_p1 = pneg %p2268_p2 }
 0x326   : > { %p2274_p3 = pnand %p2273_p8, %p2269_p1 }
 0x328   : > { %2277 = shalt.err (!%p2274_p3)
}
 0x329   : > { %s2327_s23 = smov 64   ;;  %s2328_s25 = smov 4  }
 0x32a   : > { %2065 = dma.vmem_to_hbm [thread:$0]  (%p2705_p5), %s2626_s8, 256, %s2631_s17, %s1631_s22, %s2327_s23, %s2327_s23, %s2328_s25  }
 0x32b PF: > { %s1660_s11 = sand.u32 1, %s2308_s12   ;;  %p2706_p7 = scmp.ne.s32.totalorder %s2683_s19, 0 }
 0x32c   : > { %p2707_p9 = scmp.ge.s32.totalorder %s2320_s15, 2  ;;  %s1661_s7 = scalar_lea.sflag [#allocation6], %s1660_s11 }
 0x32e   : > { %p2076_p10 = pnand %p2707_p9, %p2706_p7 }
 0x330   : > { %p2077_p12 = pneg %p2076_p10 }
 0x332   : > { %2303 = dma.done.wait (%p2077_p12), %s1661_s7, 256  }
 0x333   : > { %2305 = vsyncadd (%p2077_p12), %s1661_s7, 4294967040  ;;  %p17_p13 = scmp.ge.s32.totalorder %s2403_s24, 4   ;;  %s2708_s12 = smov %s2312_s13 }
 0x334   : > { %s2709_s13 = smov %s2316_s14  ;;  %s2710_s14 = smov %s2423_s5 }
 0x335   : > { %s2711_s15 = smov %s2403_s24  ;;  %19 = sbr.rel (!%p17_p13) target bundleno = 6 (0x6), region = 85 }
 0x33a   :  { %1666 = vsyncpa [#allocation5], 1 }
 0x33b   :  { %1668 = vsyncpa [#allocation5 + $0x1], 1 }
 0x33c   :  { %1669 = vsyncpa [#allocation8], 1 }
 0x33d   :  { %1670 = vsyncpa [#allocation6], 1 }
 0x33e   :  { %1672 = vsyncpa [#allocation6 + $0x1], 1 }

</bundles_post_ra>
